<compile_context>
chip_gen: v7x
topology: tpu7x:2x2x1
jax: 0.10.0
libtpu: 0.0.40
codegen_flags: <defaults>
</compile_context>

<pallas_src>
import jax
import jax.numpy as jnp
from jax.experimental import pallas as pl
from jax.experimental.pallas import tpu as pltpu


# ---------------------------------------------------------------------------
# Kernel (all operands transposed: batch on the lane axis)
# ---------------------------------------------------------------------------
def _discriminator_kernel(state_ref, action_ref, w1s_ref, w1a_ref, b1_ref,
                          w2_ref, b2_ref, w3_ref, b3_ref, out_ref):
    """Fused 3-layer MLP on one batch tile.

    state_ref : (S,  TB) f32      w1s_ref : (H1, S)  f32
    action_ref: (A,  TB) f32      w1a_ref : (H1, A)  f32
    b1_ref    : (H1, 1)  f32      w2_ref  : (H2, H1) bf16
    b2_ref    : (H2, 1)  f32      w3_ref  : (H2, 1)  f32
    b3_ref    : (1,  1)  f32      out_ref : (1,  TB) f32  (lane-dense)
    """
    # ---- Layer 1 (f32, concat fused away) --------------------------------
    h1 = jnp.dot(w1s_ref[...], state_ref[...],
                 preferred_element_type=jnp.float32)           # (H1, TB)
    if action_ref.shape[0] == 1:
        # action_dim == 1: broadcast outer product on the VPU.
        h1 = h1 + w1a_ref[...] * action_ref[...]
    else:
        h1 = h1 + jnp.dot(w1a_ref[...], action_ref[...],
                          preferred_element_type=jnp.float32)
    h1 = jnp.tanh(h1 + b1_ref[...])                            # f32 VPU/EUP

    # ---- Layer 2: bf16 MXU matmul, f32 accumulation ----------------------
    h2 = jnp.dot(w2_ref[...], h1.astype(jnp.bfloat16),
                 preferred_element_type=jnp.float32)           # (H2, TB)
    h2 = jnp.tanh(h2 + b2_ref[...])

    # ---- Layer 3 (N=1): VPU multiply + sublane reduce -> (1, TB) row -----
    logits = jnp.sum(h2 * w3_ref[...], axis=0, keepdims=True) + b3_ref[...]
    out_ref[...] = jax.nn.sigmoid(logits).astype(out_ref.dtype)


# ---------------------------------------------------------------------------
# Parameter helpers
# ---------------------------------------------------------------------------
def init_discriminator_params(key, state_dim, action_dim):
    """PyTorch nn.Linear default init: U(-1/sqrt(fan_in), 1/sqrt(fan_in)).
    Weights stored as (in_features, out_features); biases as (1, out)."""
    dims = [(state_dim + action_dim, 400), (400, 300), (300, 1)]
    params = []
    keys = jax.random.split(key, 2 * len(dims))
    for i, (fan_in, fan_out) in enumerate(dims):
        bound = 1.0 / jnp.sqrt(jnp.float32(fan_in))
        w = jax.random.uniform(keys[2 * i], (fan_in, fan_out),
                               minval=-bound, maxval=bound, dtype=jnp.float32)
        b = jax.random.uniform(keys[2 * i + 1], (1, fan_out),
                               minval=-bound, maxval=bound, dtype=jnp.float32)
        params.extend([w, b])
    return tuple(params)


def prepare_params(params, state_dim):
    """One-time prep: transpose everything so batch ends up on lanes, split W1
    into state/action blocks, cast only the large W2 to bf16."""
    w1, b1, w2, b2, w3, b3 = params
    w1sT = jnp.asarray(w1[:state_dim].T, jnp.float32)    # (H1, S)   f32
    w1aT = jnp.asarray(w1[state_dim:].T, jnp.float32)    # (H1, A)   f32
    b1c = jnp.asarray(b1.T, jnp.float32)                 # (H1, 1)
    w2T = jnp.asarray(w2.T, jnp.bfloat16)                # (H2, H1)  bf16
    b2c = jnp.asarray(b2.T, jnp.float32)                 # (H2, 1)
    w3c = jnp.asarray(w3, jnp.float32)                   # (H2, 1)   (column)
    b3c = jnp.asarray(b3, jnp.float32)                   # (1, 1)
    return (w1sT, w1aT, b1c, w2T, b2c, w3c, b3c)


def _round_up(x, m):
    return (x + m - 1) // m * m


def _choose_tile(B):
    """Pick (batch tile TB, padded batch Bp).

    - B <= 512: one lane-dense tile (no grid loop), padded only to a
      sublane-friendly multiple of 8.
    - Larger B: tiles that are multiples of 256 (fills the 256-wide MXU of
      v6e/v7x), preferring one that divides B (no jnp.pad copy) and leaves
      >= 2 tiles so both v7x TensorCores get work.
    """
    if B <= 512:
        bp = max(_round_up(B, 8), 8)
        return bp, bp
    for tb in (1024, 512, 256):
        if B % tb == 0 and B // tb >= 2:
            return tb, B
    tb = 512
    return tb, _round_up(B, tb)


# ---------------------------------------------------------------------------
# Forward
# ---------------------------------------------------------------------------
def discriminator_forward(state, action, prepared):
    """JAX wrapper mirroring Discriminator.forward (takes prepared params)."""
    # Faithfully mirror the torch quirk: unsqueeze unless shape is exactly
    # (10, 1).  A 2-D action that is not (10, 1) would become 3-D and the
    # original torch module would also fail at the concat -- raise clearly.
    if action.shape != (10, 1):
        action = jnp.expand_dims(action, 1)
    if action.ndim != 2:
        raise ValueError(
            "Discriminator.forward supports 1-D actions (or exactly (10, 1)); "
            f"got action shape {action.shape} after the unsqueeze quirk "
            "(the reference torch module would also fail here).")
    state = state.astype(jnp.float32)
    action = action.astype(jnp.float32)

    w1sT, w1aT, b1c, w2T, b2c, w3c, b3c = prepared
    B, S = state.shape
    A = action.shape[1]
    H1 = w1sT.shape[0]
    H2 = w2T.shape[0]

    TB, Bp = _choose_tile(B)

    # Layout plumbing only: put batch on the lane axis (lane-dense in/out).
    state_t = state.T                           # (S, B)
    action_t = action.T                         # (A, B)
    if Bp != B:                                 # avoided when TB divides B
        pad = Bp - B
        state_t = jnp.pad(state_t, ((0, 0), (0, pad)))
        action_t = jnp.pad(action_t, ((0, 0), (0, pad)))
    grid = (Bp // TB,)

    flops = 2 * Bp * (S * H1 + A * H1 + H1 * H2 + H2)
    transcendentals = Bp * (H1 + H2 + 1)
    bytes_accessed = int(
        sum(int(p.size) * p.dtype.itemsize for p in prepared)
        + int(state_t.size) * 4 + int(action_t.size) * 4 + Bp * 4)

    out = pl.pallas_call(
        _discriminator_kernel,
        out_shape=jax.ShapeDtypeStruct((1, Bp), jnp.float32),
        grid=grid,
        in_specs=[
            pl.BlockSpec((S, TB), lambda i: (0, i)),     # state^T  (tiled)
            pl.BlockSpec((A, TB), lambda i: (0, i)),     # action^T (tiled)
            pl.BlockSpec((H1, S), lambda i: (0, 0)),     # W1_state^T (resident)
            pl.BlockSpec((H1, A), lambda i: (0, 0)),     # W1_action^T
            pl.BlockSpec((H1, 1), lambda i: (0, 0)),     # b1 column
            pl.BlockSpec((H2, H1), lambda i: (0, 0)),    # W2^T (bf16, resident)
            pl.BlockSpec((H2, 1), lambda i: (0, 0)),     # b2 column
            pl.BlockSpec((H2, 1), lambda i: (0, 0)),     # W3 column
            pl.BlockSpec((1, 1), lambda i: (0, 0)),      # b3
        ],
        out_specs=pl.BlockSpec((1, TB), lambda i: (0, i)),  # lane-dense row
        compiler_params=pltpu.CompilerParams(
            dimension_semantics=("parallel",)),
        cost_estimate=pl.CostEstimate(
            flops=flops,
            transcendentals=transcendentals,
            bytes_accessed=bytes_accessed),
    )(state_t, action_t, w1sT, w1aT, b1c, w2T, b2c, w3c, b3c)

    return out[0, :B].reshape(B, 1)


# ---------------------------------------------------------------------------
# Pure-f32 reference with the exact PyTorch semantics (no quantization)
# ---------------------------------------------------------------------------
def _reference_forward(state, action, params):
    if action.shape != (10, 1):
        action = jnp.expand_dims(action, 1)
    w1, b1, w2, b2, w3, b3 = params
    x = jnp.concatenate([state.astype(jnp.float32),
                         action.astype(jnp.float32)], axis=1)
    h1 = jnp.tanh(x @ w1 + b1)
    h2 = jnp.tanh(h1 @ w2 + b2)
    return jax.nn.sigmoid(h2 @ w3 + b3)


# ---------------------------------------------------------------------------
if __name__ == "__main__":
    key = jax.random.PRNGKey(0)
    k_param, k_s1, k_a1, k_s2, k_a2 = jax.random.split(key, 5)

    state_dim, action_dim = 16, 1
    params = init_discriminator_params(k_param, state_dim, action_dim)
    prepared = prepare_params(params, state_dim)

    # Small / latency-bound case: B=8 -> single lane-dense tile, no padding.
    state = jax.random.normal(k_s1, (8, state_dim), dtype=jnp.float32)
    action = jax.random.normal(k_a1, (8,), dtype=jnp.float32)        # 1-D
    out = jax.block_until_ready(discriminator_forward(state, action, prepared))
    ref = _reference_forward(state, action, params)
    assert out.shape == (8, 1)
    assert jnp.allclose(out, ref, atol=2e-2, rtol=2e-2)

    # Larger case: B=1024 -> two 512-wide tiles (multiple of 256, zero
    # padding, >= 2 parallel tiles for v7x), exercising the grid path.
    state2 = jax.random.normal(k_s2, (1024, state_dim), dtype=jnp.float32)
    action2 = jax.random.normal(k_a2, (1024,), dtype=jnp.float32)
    out2 = jax.block_until_ready(
        discriminator_forward(state2, action2, prepared))
    ref2 = _reference_forward(state2, action2, params)
    assert out2.shape == (1024, 1)
    assert jnp.allclose(out2, ref2, atol=2e-2, rtol=2e-2)

    print("KERNEL_OK")
</pallas_src>

<mosaic_0001>
module attributes {stable_mosaic.version = 11 : i64} {
  func.func @_discriminator_kernel(%arg0: i32, %arg1: memref<16x8xf32, #tpu.memory_space<vmem>>, %arg2: memref<1x8xf32, #tpu.memory_space<vmem>>, %arg3: memref<400x16xf32, #tpu.memory_space<vmem>>, %arg4: memref<400x1xf32, #tpu.memory_space<vmem>>, %arg5: memref<400x1xf32, #tpu.memory_space<vmem>>, %arg6: memref<300x400xbf16, #tpu.memory_space<vmem>>, %arg7: memref<300x1xf32, #tpu.memory_space<vmem>>, %arg8: memref<300x1xf32, #tpu.memory_space<vmem>>, %arg9: memref<1x1xf32, #tpu.memory_space<vmem>>, %arg10: memref<1x8xf32, #tpu.memory_space<vmem>>) attributes {dimension_semantics = [#tpu.dimension_semantics<parallel>], iteration_bounds = array<i64: 1>, scalar_prefetch = 0 : i64, scratch_operands = 0 : i64, tpu.core_type = #tpu.core_type<tc>, window_params = [{transform_indices = @transform_0, window_bounds = array<i64: 16, 8>}, {transform_indices = @transform_1, window_bounds = array<i64: 1, 8>}, {pipeline_mode = #tpu.pipeline_mode<synchronous>, transform_indices = @transform_2, window_bounds = array<i64: 400, 16>}, {pipeline_mode = #tpu.pipeline_mode<synchronous>, transform_indices = @transform_3, window_bounds = array<i64: 400, 1>}, {pipeline_mode = #tpu.pipeline_mode<synchronous>, transform_indices = @transform_4, window_bounds = array<i64: 400, 1>}, {pipeline_mode = #tpu.pipeline_mode<synchronous>, transform_indices = @transform_5, window_bounds = array<i64: 300, 400>}, {pipeline_mode = #tpu.pipeline_mode<synchronous>, transform_indices = @transform_6, window_bounds = array<i64: 300, 1>}, {pipeline_mode = #tpu.pipeline_mode<synchronous>, transform_indices = @transform_7, window_bounds = array<i64: 300, 1>}, {pipeline_mode = #tpu.pipeline_mode<synchronous>, transform_indices = @transform_8, window_bounds = array<i64: 1, 1>}, {transform_indices = @transform_9, window_bounds = array<i64: 1, 8>}]} {
    %c0 = arith.constant 0 : index
    %c0_0 = arith.constant 0 : index
    %0 = vector.load %arg3[%c0, %c0_0] : memref<400x16xf32, #tpu.memory_space<vmem>>, vector<400x16xf32>
    %c0_1 = arith.constant 0 : index
    %c0_2 = arith.constant 0 : index
    %1 = vector.load %arg1[%c0_1, %c0_2] : memref<16x8xf32, #tpu.memory_space<vmem>>, vector<16x8xf32>
    %cst = arith.constant dense<0.000000e+00> : vector<400x8xf32>
    %2 = tpu.matmul %0, %1, %cst {dimension_numbers = #tpu.dot_dimension_numbers<[1], [0], [0], [1], [0, 0, 1, 1], [], []>} : vector<400x16xf32>, vector<16x8xf32>, vector<400x8xf32> -> vector<400x8xf32>
    %c0_3 = arith.constant 0 : index
    %c0_4 = arith.constant 0 : index
    %3 = vector.load %arg4[%c0_3, %c0_4] : memref<400x1xf32, #tpu.memory_space<vmem>>, vector<400x1xf32>
    %c0_5 = arith.constant 0 : index
    %c0_6 = arith.constant 0 : index
    %4 = vector.load %arg2[%c0_5, %c0_6] : memref<1x8xf32, #tpu.memory_space<vmem>>, vector<1x8xf32>
    %5 = vector.broadcast %3 : vector<400x1xf32> to vector<400x8xf32>
    %6 = vector.broadcast %4 : vector<1x8xf32> to vector<400x8xf32>
    %7 = arith.mulf %5, %6 : vector<400x8xf32>
    %8 = arith.addf %2, %7 : vector<400x8xf32>
    %c0_7 = arith.constant 0 : index
    %c0_8 = arith.constant 0 : index
    %9 = vector.load %arg5[%c0_7, %c0_8] : memref<400x1xf32, #tpu.memory_space<vmem>>, vector<400x1xf32>
    %10 = vector.broadcast %9 : vector<400x1xf32> to vector<400x8xf32>
    %11 = arith.addf %8, %10 : vector<400x8xf32>
    %12 = math.tanh %11 : vector<400x8xf32>
    %c0_9 = arith.constant 0 : index
    %c0_10 = arith.constant 0 : index
    %13 = vector.load %arg6[%c0_9, %c0_10] : memref<300x400xbf16, #tpu.memory_space<vmem>>, vector<300x400xbf16>
    %14 = arith.truncf %12 : vector<400x8xf32> to vector<400x8xbf16>
    %cst_11 = arith.constant dense<0.000000e+00> : vector<300x8xf32>
    %15 = tpu.matmul %13, %14, %cst_11 {dimension_numbers = #tpu.dot_dimension_numbers<[1], [0], [0], [1], [0, 0, 1, 1], [], []>} : vector<300x400xbf16>, vector<400x8xbf16>, vector<300x8xf32> -> vector<300x8xf32>
    %c0_12 = arith.constant 0 : index
    %c0_13 = arith.constant 0 : index
    %16 = vector.load %arg7[%c0_12, %c0_13] : memref<300x1xf32, #tpu.memory_space<vmem>>, vector<300x1xf32>
    %17 = vector.broadcast %16 : vector<300x1xf32> to vector<300x8xf32>
    %18 = arith.addf %15, %17 : vector<300x8xf32>
    %19 = math.tanh %18 : vector<300x8xf32>
    %c0_14 = arith.constant 0 : index
    %c0_15 = arith.constant 0 : index
    %20 = vector.load %arg8[%c0_14, %c0_15] : memref<300x1xf32, #tpu.memory_space<vmem>>, vector<300x1xf32>
    %21 = vector.broadcast %20 : vector<300x1xf32> to vector<300x8xf32>
    %22 = arith.mulf %19, %21 : vector<300x8xf32>
    %cst_16 = arith.constant dense<0.000000e+00> : vector<8xf32>
    %23 = vector.multi_reduction <add>, %22, %cst_16 [0] : vector<300x8xf32> to vector<8xf32>
    %24 = vector.shape_cast %23 : vector<8xf32> to vector<1x8xf32>
    %c0_17 = arith.constant 0 : index
    %c0_18 = arith.constant 0 : index
    %25 = vector.load %arg9[%c0_17, %c0_18] : memref<1x1xf32, #tpu.memory_space<vmem>>, vector<1x1xf32>
    %26 = vector.broadcast %25 : vector<1x1xf32> to vector<1x8xf32>
    %27 = arith.addf %24, %26 : vector<1x8xf32>
    %28 = arith.negf %27 : vector<1x8xf32>
    %29 = math.exp %28 : vector<1x8xf32>
    %cst_19 = arith.constant 1.000000e+00 : f32
    %30 = vector.broadcast %cst_19 : f32 to vector<1x8xf32>
    %31 = arith.addf %30, %29 : vector<1x8xf32>
    %32 = arith.divf %30, %31 : vector<1x8xf32>
    %c0_20 = arith.constant 0 : index
    %c0_21 = arith.constant 0 : index
    %33 = vector.load %arg10[%c0_20, %c0_21] : memref<1x8xf32, #tpu.memory_space<vmem>>, vector<1x8xf32>
    tpu.vector_store %arg10[%c0_20, %c0_21], %32 {strides = array<i32>} : memref<1x8xf32, #tpu.memory_space<vmem>>, vector<1x8xf32>,
    return
  }
  func.func @transform_0(%arg0: i32) -> (i32, i32) {
    %c0_i32 = arith.constant 0 : i32
    %c0_i32_0 = arith.constant 0 : i32
    return %c0_i32, %arg0 : i32, i32
  }
  func.func @transform_1(%arg0: i32) -> (i32, i32) {
    %c0_i32 = arith.constant 0 : i32
    %c0_i32_0 = arith.constant 0 : i32
    return %c0_i32, %arg0 : i32, i32
  }
  func.func @transform_2(%arg0: i32) -> (i32, i32) {
    %c0_i32 = arith.constant 0 : i32
    %c0_i32_0 = arith.constant 0 : i32
    %c0_i32_1 = arith.constant 0 : i32
    return %c0_i32, %c0_i32_0 : i32, i32
  }
  func.func @transform_3(%arg0: i32) -> (i32, i32) {
    %c0_i32 = arith.constant 0 : i32
    %c0_i32_0 = arith.constant 0 : i32
    %c0_i32_1 = arith.constant 0 : i32
    return %c0_i32, %c0_i32_0 : i32, i32
  }
  func.func @transform_4(%arg0: i32) -> (i32, i32) {
    %c0_i32 = arith.constant 0 : i32
    %c0_i32_0 = arith.constant 0 : i32
    %c0_i32_1 = arith.constant 0 : i32
    return %c0_i32, %c0_i32_0 : i32, i32
  }
  func.func @transform_5(%arg0: i32) -> (i32, i32) {
    %c0_i32 = arith.constant 0 : i32
    %c0_i32_0 = arith.constant 0 : i32
    %c0_i32_1 = arith.constant 0 : i32
    return %c0_i32, %c0_i32_0 : i32, i32
  }
  func.func @transform_6(%arg0: i32) -> (i32, i32) {
    %c0_i32 = arith.constant 0 : i32
    %c0_i32_0 = arith.constant 0 : i32
    %c0_i32_1 = arith.constant 0 : i32
    return %c0_i32, %c0_i32_0 : i32, i32
  }
  func.func @transform_7(%arg0: i32) -> (i32, i32) {
    %c0_i32 = arith.constant 0 : i32
    %c0_i32_0 = arith.constant 0 : i32
    %c0_i32_1 = arith.constant 0 : i32
    return %c0_i32, %c0_i32_0 : i32, i32
  }
  func.func @transform_8(%arg0: i32) -> (i32, i32) {
    %c0_i32 = arith.constant 0 : i32
    %c0_i32_0 = arith.constant 0 : i32
    %c0_i32_1 = arith.constant 0 : i32
    return %c0_i32, %c0_i32_0 : i32, i32
  }
  func.func @transform_9(%arg0: i32) -> (i32, i32) {
    %c0_i32 = arith.constant 0 : i32
    %c0_i32_0 = arith.constant 0 : i32
    return %c0_i32, %arg0 : i32, i32
  }
}

</mosaic_0001>

<bundles_post_ra>
// kernel: tpu_custom_call.1
= control target key start
LH: loop header
LB: loop body
LE: loop exit
PB: predicated region body
PF: predicated region fallthrough
CT: control target
= control target key end

     0   :  { %s5141_s0 = inlined_call_operand.vmem [shape: f32[16,8], index: 0, kind: input, shape index: {}]   ;;  %s5142_s1 = inlined_call_operand.vmem [shape: f32[1,8], index: 1, kind: input, shape index: {}]   ;;  %s5143_s2 = inlined_call_operand.vmem [shape: f32[400,16], index: 2, kind: input, shape index: {}]   ;;  %s5144_s3 = inlined_call_operand.vmem [shape: f32[400,1], index: 3, kind: input, shape index: {}]   ;;  %s5145_s4 = inlined_call_operand.vmem [shape: f32[400,1], index: 4, kind: input, shape index: {}]   ;;  %s5146_s5 = inlined_call_operand.vmem [shape: bf16[300,400], index: 5, kind: input, shape index: {}]   ;;  %s5147_s6 = inlined_call_operand.vmem [shape: f32[300,1], index: 6, kind: input, shape index: {}]   ;;  %s5148_s7 = inlined_call_operand.vmem [shape: f32[300,1], index: 7, kind: input, shape index: {}]   ;;  %s5149_s8 = inlined_call_operand.<no memory space> [shape: f32[1,1], index: 8, kind: input, shape index: {}]   ;;  %s5150_s9 = inlined_call_operand.hbm [shape: f32[1,8], index: 9, kind: output, shape index: {}]  }
   0x1   :  { %v14_v0 = vstv %s5149_s8 }
   0x2   :  { %15 = vst [vmem:[#allocation2] sm:$0x1] %v14_v0 }
   0x3   :  { %v90_v1 = vld [vmem:[%s5144_s3 + $0x10] sm:$0xff]  ;;  %v88_v2 = vld [vmem:[%s5144_s3] sm:$0xff]  ;;  %vm445_vm0 = vcmask 130048   ;;  %v3553_v4 = vmov 0   ;;  %v87_v5 = vld [vmem:[%s5141_s0 + $0x8] sm:$0xff] }
   0x4   :  { %v86_v3 = vld [vmem:[%s5141_s0] sm:$0xff]  ;;  %3233 = vset.pattern.permute.xlu1 %v3553_v4  ;;  %3232 = vset.pattern.permute.xlu0 %v3553_v4  ;;  %v91_v8 = vld [vmem:[%s5144_s3 + $0x18] sm:$0xff]  ;;  %v89_v9 = vld [vmem:[%s5144_s3 + $0x8] sm:$0xff] }
   0x5   :  { %151 = vperm.xlu1 %3233, %v90_v1   ;;  %141 = vperm.xlu0 %3232, %v88_v2   ;;  %v3126_v6 = vpack.c.bf16 %v87_v5, %v86_v3  ;;  %v36_v7 = vld [vmem:[%s5143_s2] sm:$0xff]  ;;  %v37_v10 = vld [vmem:[%s5143_s2 + $0x8] sm:$0xff]  ;;  %v38_v11 = vld [vmem:[%s5143_s2 + $0x10] sm:$0xff] }
   0x6   :  { %3051 = vmatprep.mubr.msk.f32.mxu0 %vm445_vm0, %v36_v7  ;;  %2058 = vmatprep.subr.bf16.mxu1 %v3553_v4  ;;  %v93_v12 = vld [vmem:[%s5144_s3 + $0x28] sm:$0xff]  ;;  %v92_v13 = vld [vmem:[%s5144_s3 + $0x20] sm:$0xff]  ;;  %v39_v14 = vld [vmem:[%s5143_s2 + $0x18] sm:$0xff] }
   0x7   :  { %3127 = vmatprep.subr.bf16.mxu0 %v3126_v6  ;;  %v40_v15 = vld [vmem:[%s5143_s2 + $0x20] sm:$0xff]  ;;  %v95_v16 = vld [vmem:[%s5144_s3 + $0x38] sm:$0xff]  ;;  %v94_v17 = vld [vmem:[%s5144_s3 + $0x30] sm:$0xff] }
   0x8   :  { %3129 = vmatpush3.bf16.msra.mxu0 %v3126_v6  ;;  %v41_v18 = vld [vmem:[%s5143_s2 + $0x28] sm:$0xff]  ;;  %v42_v19 = vld [vmem:[%s5143_s2 + $0x30] sm:$0xff]  ;;  %v96_v21 = vld [vmem:[%s5144_s3 + $0x40] sm:$0xff] }
   0x9   :  { %156 = vperm.xlu1 %3233, %v91_v8   ;;  %146 = vperm.xlu0 %3232, %v89_v9   ;;  %v97_v20 = vld [vmem:[%s5144_s3 + $0x48] sm:$0xff]  ;;  %v43_v22 = vld [vmem:[%s5143_s2 + $0x38] sm:$0xff]  ;;  %v44_v23 = vld [vmem:[%s5143_s2 + $0x40] sm:$0xff] }
   0xa   :  { %2243 = vmatprep.subr.bf16.mxu0 %v3553_v4  ;;  %v99_v24 = vld [vmem:[%s5144_s3 + $0x58] sm:$0xff]  ;;  %v98_v25 = vld [vmem:[%s5144_s3 + $0x50] sm:$0xff]  ;;  %v45_v26 = vld [vmem:[%s5143_s2 + $0x48] sm:$0xff] }
   0xb   :  { %3052 = vmatmul.mubr.msk.f32.vlgmr.msra.gmra.mrb[0].mxu0 %vm445_vm0, %v37_v10  ;;  %v46_v27 = vld [vmem:[%s5143_s2 + $0x50] sm:$0xff]  ;;  %v101_v28 = vld [vmem:[%s5144_s3 + $0x68] sm:$0xff]  ;;  %v100_v29 = vld [vmem:[%s5144_s3 + $0x60] sm:$0xff] }
   0xc   :  { %3054 = vmatprep.mubr.msk.f32.mxu0 %vm445_vm0, %v38_v11  ;;  %v47_v30 = vld [vmem:[%s5143_s2 + $0x58] sm:$0xff]  ;;  %v48_v31 = vld [vmem:[%s5143_s2 + $0x60] sm:$0xff]  ;;  %v102_v33 = vld [vmem:[%s5144_s3 + $0x70] sm:$0xff] }
   0xd   :  { %166 = vperm.xlu1 %3233, %v93_v12   ;;  %161 = vperm.xlu0 %3232, %v92_v13   ;;  %v103_v32 = vld [vmem:[%s5144_s3 + $0x78] sm:$0xff]  ;;  %v49_v34 = vld [vmem:[%s5143_s2 + $0x68] sm:$0xff]  ;;  %v50_v35 = vld [vmem:[%s5143_s2 + $0x70] sm:$0xff] }
   0xe   :  { %v105_v36 = vld [vmem:[%s5144_s3 + $0x88] sm:$0xff]  ;;  %v104_v37 = vld [vmem:[%s5144_s3 + $0x80] sm:$0xff]  ;;  %v51_v38 = vld [vmem:[%s5143_s2 + $0x78] sm:$0xff] }
   0xf   :  { %3055 = vmatmul.mubr.msk.f32.gmra.mrb[2].mxu0 %vm445_vm0, %v39_v14  ;;  %v52_v39 = vld [vmem:[%s5143_s2 + $0x80] sm:$0xff]  ;;  %v107_v40 = vld [vmem:[%s5144_s3 + $0x98] sm:$0xff]  ;;  %v106_v41 = vld [vmem:[%s5144_s3 + $0x90] sm:$0xff] }
  0x10   :  { %3057 = vmatprep.mubr.msk.f32.mxu0 %vm445_vm0, %v40_v15  ;;  %v53_v42 = vld [vmem:[%s5143_s2 + $0x88] sm:$0xff]  ;;  %v54_v43 = vld [vmem:[%s5143_s2 + $0x90] sm:$0xff]  ;;  %v108_v45 = vld [vmem:[%s5144_s3 + $0xa0] sm:$0xff] }
  0x11   :  { %176 = vperm.xlu1 %3233, %v95_v16   ;;  %171 = vperm.xlu0 %3232, %v94_v17   ;;  %v109_v44 = vld [vmem:[%s5144_s3 + $0xa8] sm:$0xff]  ;;  %v55_v46 = vld [vmem:[%s5143_s2 + $0x98] sm:$0xff]  ;;  %v56_v47 = vld [vmem:[%s5143_s2 + $0xa0] sm:$0xff] }
  0x12   :  { %v111_v48 = vld [vmem:[%s5144_s3 + $0xb8] sm:$0xff]  ;;  %v110_v49 = vld [vmem:[%s5144_s3 + $0xb0] sm:$0xff]  ;;  %v57_v50 = vld [vmem:[%s5143_s2 + $0xa8] sm:$0xff] }
  0x13   :  { %3058 = vmatmul.mubr.msk.f32.gmra.mrb[4].mxu0 %vm445_vm0, %v41_v18  ;;  %v113_v51 = vld [vmem:[%s5144_s3 + $0xc8] sm:$0xff]  ;;  %v112_v52 = vld [vmem:[%s5144_s3 + $0xc0] sm:$0xff]  ;;  %v58_v53 = vld [vmem:[%s5143_s2 + $0xb0] sm:$0xff] }
  0x14   :  { %3060 = vmatprep.mubr.msk.f32.mxu0 %vm445_vm0, %v42_v19  ;;  %v59_v54 = vld [vmem:[%s5143_s2 + $0xb8] sm:$0xff]  ;;  %v114_v56 = vld [vmem:[%s5144_s3 + $0xd0] sm:$0xff]  ;;  %v60_v57 = vld [vmem:[%s5143_s2 + $0xc0] sm:$0xff] }
  0x15   :  { %186 = vperm.xlu1 %3233, %v97_v20   ;;  %181 = vperm.xlu0 %3232, %v96_v21   ;;  %v115_v55 = vld [vmem:[%s5144_s3 + $0xd8] sm:$0xff]  ;;  %v61_v58 = vld [vmem:[%s5143_s2 + $0xc8] sm:$0xff]  ;;  %v116_v60 = vld [vmem:[%s5144_s3 + $0xe0] sm:$0xff] }
  0x16   :  { %v117_v59 = vld [vmem:[%s5144_s3 + $0xe8] sm:$0xff]  ;;  %v62_v61 = vld [vmem:[%s5143_s2 + $0xd0] sm:$0xff]  ;;  %v63_v62 = vld [vmem:[%s5143_s2 + $0xd8] sm:$0xff] }
  0x17   :  { %3061 = vmatmul.mubr.msk.f32.gmra.mrb[6].mxu0 %vm445_vm0, %v43_v22  ;;  %v911_v63 = vld [vmem:[%s5145_s4] sm:$0xff]  ;;  %v118_v0 = vld [vmem:[%s5144_s3 + $0xf0] sm:$0xff]  ;;  %v65_v2 = vld [vmem:[%s5143_s2 + $0xe8] sm:$0xff] }
  0x18   :  { %3063 = vmatprep.mubr.msk.f32.mxu0 %vm445_vm0, %v44_v23  ;;  %v64_v1 = vld [vmem:[%s5143_s2 + $0xe0] sm:$0xff]  ;;  %v913_v3 = vld [vmem:[%s5145_s4 + $0x10] sm:$0xff]  ;;  %v912_v5 = vld [vmem:[%s5145_s4 + $0x8] sm:$0xff] }
  0x19   :  { %196 = vperm.xlu1 %3233, %v99_v24   ;;  %191 = vperm.xlu0 %3232, %v98_v25   ;;  %v66_v6 = vld [vmem:[%s5143_s2 + $0xf0] sm:$0xff]  ;;  %v67_v7 = vld [vmem:[%s5143_s2 + $0xf8] sm:$0xff]  ;;  %v915_v8 = vld [vmem:[%s5145_s4 + $0x20] sm:$0xff] }
  0x1a   :  { %v914_v9 = vld [vmem:[%s5145_s4 + $0x18] sm:$0xff]  ;;  %v68_v10 = vld [vmem:[%s5143_s2 + $0x100] sm:$0xff]  ;;  %v69_v11 = vld [vmem:[%s5143_s2 + $0x108] sm:$0xff] }
  0x1b   :  { %3064 = vmatmul.mubr.msk.f32.gmra.mrb[8].mxu0 %vm445_vm0, %v45_v26  ;;  %v917_v12 = vld [vmem:[%s5145_s4 + $0x30] sm:$0xff]  ;;  %v916_v13 = vld [vmem:[%s5145_s4 + $0x28] sm:$0xff]  ;;  %v71_v15 = vld [vmem:[%s5143_s2 + $0x118] sm:$0xff] }
  0x1c   :  { %3066 = vmatprep.mubr.msk.f32.mxu0 %vm445_vm0, %v46_v27  ;;  %v70_v14 = vld [vmem:[%s5143_s2 + $0x110] sm:$0xff]  ;;  %v919_v16 = vld [vmem:[%s5145_s4 + $0x40] sm:$0xff]  ;;  %v918_v17 = vld [vmem:[%s5145_s4 + $0x38] sm:$0xff] }
  0x1d   :  { %206 = vperm.xlu1 %3233, %v101_v28   ;;  %201 = vperm.xlu0 %3232, %v100_v29   ;;  %v72_v18 = vld [vmem:[%s5143_s2 + $0x120] sm:$0xff]  ;;  %v73_v19 = vld [vmem:[%s5143_s2 + $0x128] sm:$0xff] }
  0x1f   :  { %3067 = vmatmul.mubr.msk.f32.gmra.mrb[10].mxu0 %vm445_vm0, %v47_v30 }
  0x20   :  { %3069 = vmatprep.mubr.msk.f32.mxu0 %vm445_vm0, %v48_v31 }
  0x21   :  { %216 = vperm.xlu1 %3233, %v103_v32   ;;  %211 = vperm.xlu0 %3232, %v102_v33  }
  0x23   :  { %3070 = vmatmul.mubr.msk.f32.gmra.mrb[12].mxu0 %vm445_vm0, %v49_v34 }
  0x24   :  { %3072 = vmatprep.mubr.msk.f32.mxu0 %vm445_vm0, %v50_v35 }
  0x25   :  { %226 = vperm.xlu1 %3233, %v105_v36   ;;  %221 = vperm.xlu0 %3232, %v104_v37  }
  0x27   :  { %3073 = vmatmul.mubr.msk.f32.gmra.mrb[14].mxu0 %vm445_vm0, %v51_v38 }
  0x28   :  { %3075 = vmatprep.mubr.msk.f32.mxu0 %vm445_vm0, %v52_v39 }
  0x29   :  { %236 = vperm.xlu1 %3233, %v107_v40   ;;  %231 = vperm.xlu0 %3232, %v106_v41  }
  0x2b   :  { %3076 = vmatmul.mubr.msk.f32.gmra.mrb[16].mxu0 %vm445_vm0, %v53_v42 }
  0x2c   :  { %3078 = vmatprep.mubr.msk.f32.mxu0 %vm445_vm0, %v54_v43 }
  0x2d   :  { %246 = vperm.xlu1 %3233, %v109_v44   ;;  %241 = vperm.xlu0 %3232, %v108_v45  }
  0x2f   :  { %3079 = vmatmul.mubr.msk.f32.gmra.mrb[18].mxu0 %vm445_vm0, %v55_v46 }
  0x30   :  { %3081 = vmatprep.mubr.msk.f32.mxu0 %vm445_vm0, %v56_v47 }
  0x31   :  { %256 = vperm.xlu1 %3233, %v111_v48   ;;  %251 = vperm.xlu0 %3232, %v110_v49  }
  0x33   :  { %3082 = vmatmul.mubr.msk.f32.gmra.mrb[20].mxu0 %vm445_vm0, %v57_v50 }
  0x34   :  { %3084 = vmatprep.mubr.msk.f32.mxu0 %vm445_vm0, %v58_v53 }
  0x35   :  { %266 = vperm.xlu1 %3233, %v113_v51   ;;  %261 = vperm.xlu0 %3232, %v112_v52  }
  0x37   :  { %3085 = vmatmul.mubr.msk.f32.gmra.mrb[22].mxu0 %vm445_vm0, %v59_v54 }
  0x38   :  { %3087 = vmatprep.mubr.msk.f32.mxu0 %vm445_vm0, %v60_v57 }
  0x39   :  { %276 = vperm.xlu1 %3233, %v115_v55   ;;  %271 = vperm.xlu0 %3232, %v114_v56  }
  0x3b   :  { %3088 = vmatmul.mubr.msk.f32.gmra.mrb[24].mxu0 %vm445_vm0, %v61_v58 }
  0x3c   :  { %3090 = vmatprep.mubr.msk.f32.mxu0 %vm445_vm0, %v62_v61 }
  0x3d   :  { %286 = vperm.xlu1 %3233, %v117_v59   ;;  %281 = vperm.xlu0 %3232, %v116_v60  }
  0x3f   :  { %3091 = vmatmul.mubr.msk.f32.gmra.mrb[26].mxu0 %vm445_vm0, %v63_v62 }
  0x40   :  { %3093 = vmatprep.mubr.msk.f32.mxu0 %vm445_vm0, %v64_v1 }
  0x41   :  { %963 = vperm.xlu1 %3233, %v911_v63   ;;  %291 = vperm.xlu0 %3232, %v118_v0  }
  0x43   :  { %3094 = vmatmul.mubr.msk.f32.gmra.mrb[28].mxu0 %vm445_vm0, %v65_v2 }
  0x44   :  { %3096 = vmatprep.mubr.msk.f32.mxu0 %vm445_vm0, %v66_v6 }
  0x45   :  { %973 = vperm.xlu1 %3233, %v913_v3   ;;  %968 = vperm.xlu0 %3232, %v912_v5  }
  0x47   :  { %3097 = vmatmul.mubr.msk.f32.gmra.mrb[30].mxu0 %vm445_vm0, %v67_v7 }
  0x48   :  { %3099 = vmatprep.mubr.msk.f32.mxu0 %vm445_vm0, %v68_v10 }
  0x49   :  { %983 = vperm.xlu1 %3233, %v915_v8   ;;  %978 = vperm.xlu0 %3232, %v914_v9  }
  0x4b   :  { %3100 = vmatmul.mubr.msk.f32.gmra.mrb[32].mxu0 %vm445_vm0, %v69_v11 }
  0x4c   :  { %3102 = vmatprep.mubr.msk.f32.mxu0 %vm445_vm0, %v70_v14 }
  0x4d   :  { %993 = vperm.xlu1 %3233, %v917_v12   ;;  %988 = vperm.xlu0 %3232, %v916_v13  }
  0x4f   :  { %3103 = vmatmul.mubr.msk.f32.gmra.mrb[34].mxu0 %vm445_vm0, %v71_v15 }
  0x50   :  { %3105 = vmatprep.mubr.msk.f32.mxu0 %vm445_vm0, %v72_v18 }
  0x51   :  { %16 = vsyncpa [#allocation4], 0  ;;  %1003 = vperm.xlu1 %3233, %v919_v16   ;;  %998 = vperm.xlu0 %3232, %v918_v17   ;;  %v74_v20 = vld [vmem:[%s5143_s2 + $0x130] sm:$0xff]  ;;  %v920_v22 = vld [vmem:[%s5145_s4 + $0x48] sm:$0xff]  ;;  %vm2732_vm1 = vcmask 64512   ;;  %vm2806_vm2 = vcmask 60416  }
  0x52   :  { %v921_v21 = vld [vmem:[%s5145_s4 + $0x50] sm:$0xff]  ;;  %v75_v23 = vld [vmem:[%s5143_s2 + $0x138] sm:$0xff]  ;;  %v76_v24 = vld [vmem:[%s5143_s2 + $0x140] sm:$0xff]  ;;  %vm2832_vm3 = vcmask 57344  }
  0x53   :  { %3106 = vmatmul.mubr.msk.f32.gmra.mrb[36].mxu0 %vm445_vm0, %v73_v19  ;;  %v923_v25 = vld [vmem:[%s5145_s4 + $0x60] sm:$0xff]  ;;  %v922_v26 = vld [vmem:[%s5145_s4 + $0x58] sm:$0xff]  ;;  %v77_v27 = vld [vmem:[%s5143_s2 + $0x148] sm:$0xff] }
  0x54   :  { %3108 = vmatprep.mubr.msk.f32.mxu0 %vm445_vm0, %v74_v20  ;;  %v78_v28 = vld [vmem:[%s5143_s2 + $0x150] sm:$0xff]  ;;  %v924_v30 = vld [vmem:[%s5145_s4 + $0x68] sm:$0xff]  ;;  %v79_v31 = vld [vmem:[%s5143_s2 + $0x158] sm:$0xff] }
  0x55   :  { %1013 = vperm.xlu1 %3233, %v921_v21   ;;  %1008 = vperm.xlu0 %3232, %v920_v22   ;;  %v925_v29 = vld [vmem:[%s5145_s4 + $0x70] sm:$0xff]  ;;  %v80_v32 = vld [vmem:[%s5143_s2 + $0x160] sm:$0xff]  ;;  %v926_v34 = vld [vmem:[%s5145_s4 + $0x78] sm:$0xff] }
  0x56   :  { %v927_v33 = vld [vmem:[%s5145_s4 + $0x80] sm:$0xff]  ;;  %v81_v35 = vld [vmem:[%s5143_s2 + $0x168] sm:$0xff]  ;;  %v82_v36 = vld [vmem:[%s5143_s2 + $0x170] sm:$0xff] }
  0x57   :  { %3109 = vmatmul.mubr.msk.f32.gmra.mrb[38].mxu0 %vm445_vm0, %v75_v23  ;;  %v929_v37 = vld [vmem:[%s5145_s4 + $0x90] sm:$0xff]  ;;  %v928_v38 = vld [vmem:[%s5145_s4 + $0x88] sm:$0xff]  ;;  %v83_v39 = vld [vmem:[%s5143_s2 + $0x178] sm:$0xff] }
  0x58   :  { %3111 = vmatprep.mubr.msk.f32.mxu0 %vm445_vm0, %v76_v24  ;;  %v84_v40 = vld [vmem:[%s5143_s2 + $0x180] sm:$0xff]  ;;  %v930_v42 = vld [vmem:[%s5145_s4 + $0x98] sm:$0xff]  ;;  %v85_v43 = vld [vmem:[%s5143_s2 + $0x188] sm:$0xff] }
  0x59   :  { %1023 = vperm.xlu1 %3233, %v923_v25   ;;  %1018 = vperm.xlu0 %3232, %v922_v26   ;;  %v931_v41 = vld [vmem:[%s5145_s4 + $0xa0] sm:$0xff]  ;;  %v933_v44 = vld [vmem:[%s5145_s4 + $0xb0] sm:$0xff]  ;;  %v932_v45 = vld [vmem:[%s5145_s4 + $0xa8] sm:$0xff] }
  0x5a   :  { %v935_v46 = vld [vmem:[%s5145_s4 + $0xc0] sm:$0xff]  ;;  %v934_v47 = vld [vmem:[%s5145_s4 + $0xb8] sm:$0xff]  ;;  %v937_v48 = vld [vmem:[%s5145_s4 + $0xd0] sm:$0xff] }
  0x5b   :  { %3112 = vmatmul.mubr.msk.f32.gmra.mrb[40].mxu0 %vm445_vm0, %v77_v27  ;;  %v936_v49 = vld [vmem:[%s5145_s4 + $0xc8] sm:$0xff]  ;;  %v119_v50 = vld [vmem:[%s5144_s3 + $0xf8] sm:$0xff]  ;;  %v939_v53 = vld [vmem:[%s5145_s4 + $0xe0] sm:$0xff] }
  0x5c   :  { %3114 = vmatprep.mubr.msk.f32.mxu0 %vm445_vm0, %v78_v28  ;;  %v938_v51 = vld [vmem:[%s5145_s4 + $0xd8] sm:$0xff]  ;;  %v940_v52 = vld [vmem:[%s5145_s4 + $0xe8] sm:$0xff]  ;;  %v120_v55 = vld [vmem:[%s5144_s3 + $0x100] sm:$0xff] }
  0x5d   :  { %1033 = vperm.xlu1 %3233, %v925_v29   ;;  %1028 = vperm.xlu0 %3232, %v924_v30   ;;  %v121_v54 = vld [vmem:[%s5144_s3 + $0x108] sm:$0xff]  ;;  %v942_v56 = vld [vmem:[%s5145_s4 + $0xf8] sm:$0xff]  ;;  %v941_v57 = vld [vmem:[%s5145_s4 + $0xf0] sm:$0xff] }
  0x5e   :  { %v123_v60 = vld [vmem:[%s5144_s3 + $0x118] sm:$0xff]  ;;  %v122_v61 = vld [vmem:[%s5144_s3 + $0x110] sm:$0xff]  ;;  %v944_v0 = vld [vmem:[%s5145_s4 + $0x108] sm:$0xff] }
  0x5f   :  { %3115 = vmatmul.mubr.msk.f32.gmra.mrb[42].mxu0 %vm445_vm0, %v79_v31  ;;  %v943_v1 = vld [vmem:[%s5145_s4 + $0x100] sm:$0xff]  ;;  %v125_v5 = vld [vmem:[%s5144_s3 + $0x128] sm:$0xff]  ;;  %v946_v9 = vld [vmem:[%s5145_s4 + $0x118] sm:$0xff] }
  0x60   :  { %3117 = vmatprep.mubr.msk.f32.mxu0 %vm445_vm0, %v80_v32  ;;  %v124_v6 = vld [vmem:[%s5144_s3 + $0x120] sm:$0xff]  ;;  %v945_v10 = vld [vmem:[%s5145_s4 + $0x110] sm:$0xff]  ;;  %v127_v13 = vld [vmem:[%s5144_s3 + $0x138] sm:$0xff] }
  0x61   :  { %1043 = vperm.xlu1 %3233, %v927_v33   ;;  %1038 = vperm.xlu0 %3232, %v926_v34   ;;  %v126_v14 = vld [vmem:[%s5144_s3 + $0x130] sm:$0xff]  ;;  %v948_v17 = vld [vmem:[%s5145_s4 + $0x128] sm:$0xff]  ;;  %v947_v18 = vld [vmem:[%s5145_s4 + $0x120] sm:$0xff] }
  0x62   :  { %v129_v21 = vld [vmem:[%s5144_s3 + $0x148] sm:$0xff]  ;;  %v128_v22 = vld [vmem:[%s5144_s3 + $0x140] sm:$0xff]  ;;  %v950_v25 = vld [vmem:[%s5145_s4 + $0x138] sm:$0xff] }
  0x63   :  { %3118 = vmatmul.mubr.msk.f32.gmra.mrb[44].mxu0 %vm445_vm0, %v81_v35  ;;  %v949_v26 = vld [vmem:[%s5145_s4 + $0x130] sm:$0xff]  ;;  %v131_v29 = vld [vmem:[%s5144_s3 + $0x158] sm:$0xff]  ;;  %v952_v33 = vld [vmem:[%s5145_s4 + $0x148] sm:$0xff] }
  0x64   :  { %3120 = vmatprep.mubr.msk.f32.mxu0 %vm445_vm0, %v82_v36  ;;  %v130_v30 = vld [vmem:[%s5144_s3 + $0x150] sm:$0xff]  ;;  %v951_v34 = vld [vmem:[%s5145_s4 + $0x140] sm:$0xff] }
  0x65   :  { %1053 = vperm.xlu1 %3233, %v929_v37   ;;  %1048 = vperm.xlu0 %3232, %v928_v38   ;;  %v3236_v37 = vld [vmem:[%s5146_s5 + $0x4] ss:$16 sps:$4 sm:$0xff]   ;;  %v133_v38 = vld [vmem:[%s5144_s3 + $0x168] sm:$0xff] }
  0x66   :  { %2090 = vmatprep.mubr.bf16.mxu1 %v3236_v37  ;;  %v1419_v37 = vld [vmem:[%s5147_s6 + $0x38] sm:$0xff] }
  0x67   :  { %3121 = vmatmul.mubr.msk.f32.gmra.mrb[46].mxu0 %vm445_vm0, %v83_v39  ;;  %v132_v39 = vld [vmem:[%s5144_s3 + $0x160] sm:$0xff] }
  0x68   :  { %3123 = vmatprep.mubr.msk.f32.mxu0 %vm445_vm0, %v84_v40 }
  0x69   :  { %1063 = vperm.xlu1 %3233, %v931_v41   ;;  %1058 = vperm.xlu0 %3232, %v930_v42   ;;  %v954_v42 = vld [vmem:[%s5145_s4 + $0x158] sm:$0xff] }
  0x6b   :  { %3124 = vmatmul.mubr.msk.f32.gmra.mrb[48].mxu0 %vm445_vm0, %v85_v43  ;;  %v953_v43 = vld [vmem:[%s5145_s4 + $0x150] sm:$0xff] }
  0x6d   :  { %1073 = vperm.xlu1 %3233, %v933_v44   ;;  %1068 = vperm.xlu0 %3232, %v932_v45  }
  0x71   :  { %1083 = vperm.xlu1 %3233, %v935_v46   ;;  %1078 = vperm.xlu0 %3232, %v934_v47   ;;  %v135_v46 = vld [vmem:[%s5144_s3 + $0x178] sm:$0xff]  ;;  %v134_v47 = vld [vmem:[%s5144_s3 + $0x170] sm:$0xff] }
  0x75   :  { %1093 = vperm.xlu1 %3233, %v937_v48   ;;  %1088 = vperm.xlu0 %3232, %v936_v49  }
  0x79   :  { %296 = vperm.xlu1 %3233, %v119_v50   ;;  %1098 = vperm.xlu0 %3232, %v938_v51   ;;  %v956_v50 = vld [vmem:[%s5145_s4 + $0x168] sm:$0xff]  ;;  %v955_v51 = vld [vmem:[%s5145_s4 + $0x160] sm:$0xff] }
  0x7d   :  { %1108 = vperm.xlu1 %3233, %v940_v52   ;;  %1103 = vperm.xlu0 %3232, %v939_v53  }
  0x81   :  { %306 = vperm.xlu1 %3233, %v121_v54   ;;  %301 = vperm.xlu0 %3232, %v120_v55   ;;  %v137_v54 = vld [vmem:[%s5144_s3 + $0x188] sm:$0xff]  ;;  %v136_v55 = vld [vmem:[%s5144_s3 + $0x180] sm:$0xff] }
  0x84   :  { %v4016_v58 = vpop.permute.xlu1 %151  ;;  %v4018_v59 = vpop.permute.xlu0 %141 }
  0x85   :  { %1118 = vperm.xlu1 %3233, %v942_v56   ;;  %1113 = vperm.xlu0 %3232, %v941_v57  }
  0x88   :  { %v4026_v62 = vpop.permute.xlu1 %156  ;;  %v4028_v63 = vpop.permute.xlu0 %146 }
  0x89   :  { %316 = vperm.xlu1 %3233, %v123_v60   ;;  %311 = vperm.xlu0 %3232, %v122_v61   ;;  %v958_v60 = vld [vmem:[%s5145_s4 + $0x178] sm:$0xff]  ;;  %v957_v61 = vld [vmem:[%s5145_s4 + $0x170] sm:$0xff] }
  0x8c   :  { %v4036_v2 = vpop.permute.xlu1 %166  ;;  %v4038_v3 = vpop.permute.xlu0 %161 }
  0x8d   :  { %1128 = vperm.xlu1 %3233, %v944_v0   ;;  %1123 = vperm.xlu0 %3232, %v943_v1  }
  0x90   :  { %v4046_v7 = vpop.permute.xlu1 %176  ;;  %v4048_v8 = vpop.permute.xlu0 %171 }
  0x91   :  { %326 = vperm.xlu1 %3233, %v125_v5   ;;  %321 = vperm.xlu0 %3232, %v124_v6   ;;  %v960_v5 = vld [vmem:[%s5145_s4 + $0x188] sm:$0xff]  ;;  %v959_v6 = vld [vmem:[%s5145_s4 + $0x180] sm:$0xff] }
  0x94   :  { %v4056_v11 = vpop.permute.xlu1 %186  ;;  %v4058_v12 = vpop.permute.xlu0 %181 }
  0x95   :  { %1138 = vperm.xlu1 %3233, %v946_v9   ;;  %1133 = vperm.xlu0 %3232, %v945_v10  }
  0x98   :  { %v4066_v15 = vpop.permute.xlu1 %196  ;;  %v4068_v16 = vpop.permute.xlu0 %191 }
  0x99   :  { %336 = vperm.xlu1 %3233, %v127_v13   ;;  %331 = vperm.xlu0 %3232, %v126_v14   ;;  %v1413_v13 = vld [vmem:[%s5147_s6 + $0x8] sm:$0xff]  ;;  %v1412_v14 = vld [vmem:[%s5147_s6] sm:$0xff] }
  0x9c   :  { %v4076_v19 = vpop.permute.xlu1 %206  ;;  %v4078_v20 = vpop.permute.xlu0 %201 }
  0x9d   :  { %1148 = vperm.xlu1 %3233, %v948_v17   ;;  %1143 = vperm.xlu0 %3232, %v947_v18  }
  0xa0   :  { %v4086_v23 = vpop.permute.xlu1 %216  ;;  %v4088_v24 = vpop.permute.xlu0 %211 }
  0xa1   :  { %346 = vperm.xlu1 %3233, %v129_v21   ;;  %341 = vperm.xlu0 %3232, %v128_v22   ;;  %v1415_v21 = vld [vmem:[%s5147_s6 + $0x18] sm:$0xff]  ;;  %v1414_v22 = vld [vmem:[%s5147_s6 + $0x10] sm:$0xff] }
  0xa4   :  { %v4096_v27 = vpop.permute.xlu1 %226  ;;  %v4098_v28 = vpop.permute.xlu0 %221 }
  0xa5   :  { %1158 = vperm.xlu1 %3233, %v950_v25   ;;  %1153 = vperm.xlu0 %3232, %v949_v26  }
  0xa8   :  { %v4106_v31 = vpop.permute.xlu1 %236  ;;  %v4108_v32 = vpop.permute.xlu0 %231 }
  0xa9   :  { %356 = vperm.xlu1 %3233, %v131_v29   ;;  %351 = vperm.xlu0 %3232, %v130_v30   ;;  %v1417_v29 = vld [vmem:[%s5147_s6 + $0x28] sm:$0xff]  ;;  %v1416_v30 = vld [vmem:[%s5147_s6 + $0x20] sm:$0xff] }
  0xac   :  { %v4116_v35 = vpop.permute.xlu1 %246  ;;  %v4118_v36 = vpop.permute.xlu0 %241 }
  0xad   :  { %1168 = vperm.xlu1 %3233, %v952_v33   ;;  %1163 = vperm.xlu0 %3232, %v951_v34  }
  0xb0   :  { %v4129_v40 = vpop.permute.xlu1 %256  ;;  %v4131_v41 = vpop.permute.xlu0 %251 }
  0xb1   :  { %366 = vperm.xlu1 %3233, %v133_v38   ;;  %361 = vperm.xlu0 %3232, %v132_v39   ;;  %v1418_v38 = vld [vmem:[%s5147_s6 + $0x30] sm:$0xff] }
  0xb4   :  { %v4139_v44 = vpop.permute.xlu1 %266  ;;  %v4141_v45 = vpop.permute.xlu0 %261 }
  0xb5   :  { %1178 = vperm.xlu1 %3233, %v954_v42   ;;  %1173 = vperm.xlu0 %3232, %v953_v43   ;;  %v3254_v43 = vld [vmem:[%s5146_s5 + $0xc] ss:$16 sps:$4 sm:$0xff]  }
  0xb6   :  { %2975 = vmatprep.mubr.msk.bf16.mxu0 %vm445_vm0, %v3254_v43  ;;  %v1425_v43 = vld [vmem:[%s5147_s6 + $0x68] sm:$0xff] }
  0xb8   :  { %v4149_v48 = vpop.permute.xlu1 %276  ;;  %v4151_v49 = vpop.permute.xlu0 %271 }
  0xb9   :  { %376 = vperm.xlu1 %3233, %v135_v46   ;;  %371 = vperm.xlu0 %3232, %v134_v47   ;;  %v1421_v46 = vld [vmem:[%s5147_s6 + $0x48] sm:$0xff]  ;;  %v1420_v47 = vld [vmem:[%s5147_s6 + $0x40] sm:$0xff] }
  0xbc   :  { %v4159_v52 = vpop.permute.xlu1 %286  ;;  %v4161_v53 = vpop.permute.xlu0 %281 }
  0xbd   :  { %1188 = vperm.xlu1 %3233, %v956_v50   ;;  %1183 = vperm.xlu0 %3232, %v955_v51   ;;  %v4243_v50 = vld [vmem:[%s5142_s1] ss:$0 sm:$0xff] }
  0xc0   :  { %v4169_v56 = vpop.permute.xlu1 %963  ;;  %v4171_v57 = vpop.permute.xlu0 %291 }
  0xc1   :  { %386 = vperm.xlu1 %3233, %v137_v54   ;;  %381 = vperm.xlu0 %3232, %v136_v55   ;;  %v396_v55 = vmul.f32 %v4243_v50, %v4028_v63 }
  0xc4   :  { %v4179_v0 = vpop.permute.xlu1 %973  ;;  %v969_v1 = vpop.permute.xlu0 %968 }
  0xc5   :  { %1198 = vperm.xlu1 %3233, %v958_v60   ;;  %1193 = vperm.xlu0 %3232, %v957_v61   ;;  %v395_v60 = vmul.f32 %v4243_v50, %v4018_v59 }
  0xc8   :  { %v4187_v9 = vpop.permute.xlu1 %983  ;;  %v4189_v10 = vpop.permute.xlu0 %978 }
  0xc9   :  { %1208 = vperm.xlu1 %3233, %v960_v5   ;;  %1203 = vperm.xlu0 %3232, %v959_v6   ;;  %v1423_v5 = vld [vmem:[%s5147_s6 + $0x58] sm:$0xff]  ;;  %v1422_v6 = vld [vmem:[%s5147_s6 + $0x50] sm:$0xff] }
  0xcc   :  { %v4197_v17 = vpop.permute.xlu1 %993  ;;  %v4199_v18 = vpop.permute.xlu0 %988 }
  0xcd   :  { %1457 = vperm.xlu1 %3233, %v1413_v13   ;;  %1452 = vperm.xlu0 %3232, %v1412_v14  }
  0xd0   :  { %v4207_v25 = vpop.permute.xlu1 %1003  ;;  %v4209_v26 = vpop.permute.xlu0 %998 }
  0xd1   :  { %1467 = vperm.xlu1 %3233, %v1415_v21   ;;  %1462 = vperm.xlu0 %3232, %v1414_v22  }
  0xd4   :  { %v4217_v33 = vpop.permute.xlu1 %1013  ;;  %v4219_v34 = vpop.permute.xlu0 %1008 }
  0xd5   :  { %1477 = vperm.xlu1 %3233, %v1417_v29   ;;  %1472 = vperm.xlu0 %3232, %v1416_v30   ;;  %v398_v29 = vmul.f32 %v4243_v50, %v4026_v62  ;;  %v397_v30 = vmul.f32 %v4243_v50, %v4016_v58  ;;  %v400_v58 = vmul.f32 %v4243_v50, %v4036_v2 }
  0xd8   :  { %v4227_v39 = vpop.permute.xlu1 %1023  ;;  %v4229_v42 = vpop.permute.xlu0 %1018 }
  0xd9   :  { %1487 = vperm.xlu1 %3233, %v1419_v37   ;;  %1482 = vperm.xlu0 %3232, %v1418_v38  }
  0xdc   :  { %v4246_v51 = vpop.permute.xlu1 %1033  ;;  %v4248_v54 = vpop.permute.xlu0 %1028 }
  0xdd   :  { %1497 = vperm.xlu1 %3233, %v1421_v46   ;;  %1492 = vperm.xlu0 %3232, %v1420_v47   ;;  %v1424_v46 = vld [vmem:[%s5147_s6 + $0x60] sm:$0xff] }
  0xde   :  { %v3053_v61 = vpop.f32.mrb[0].mxu0 }
  0xdf   :  { %v668_v13 = vadd.f32 %v3053_v61, %v396_v55  ;;  %v662_v14 = vpop.f32.mrb[1].mxu0  ;;  %v399_v61 = vmul.f32 %v4243_v50, %v4038_v3  ;;  %v402_v3 = vmul.f32 %v4243_v50, %v4046_v7 }
  0xe0   :  { %v663_v21 = vadd.f32 %v662_v14, %v395_v60  ;;  %v4260_v22 = vpop.permute.xlu1 %1043  ;;  %v4262_v63 = vpop.permute.xlu0 %1038  ;;  %v1426_v14 = vld [vmem:[%s5147_s6 + $0x70] sm:$0xff] }
  0xe1   :  { %v1212_v59 = vadd.f32 %v969_v1, %v668_v13  ;;  %1507 = vperm.xlu1 %3233, %v1423_v5   ;;  %1502 = vperm.xlu0 %3232, %v1422_v6   ;;  %v1427_v13 = vld [vmem:[%s5147_s6 + $0x78] sm:$0xff] }
  0xe2   :  { %v1211_v37 = vadd.f32 %v4169_v56, %v663_v21  ;;  %v3056_v38 = vpop.f32.mrb[2].mxu0 }
  0xe3   :  { %3348 = vtanh.f32 %v1212_v59  ;;  %v678_v47 = vadd.f32 %v3056_v38, %v398_v29  ;;  %v672_v62 = vpop.f32.mrb[3].mxu0 }
  0xe4   :  { %3350 = vtanh.f32 %v1211_v37  ;;  %v673_v1 = vadd.f32 %v672_v62, %v397_v30  ;;  %v4275_v55 = vpop.permute.xlu1 %1053  ;;  %v4277_v60 = vpop.permute.xlu0 %1048  ;;  %v401_v30 = vmul.f32 %v4243_v50, %v4048_v8 }
  0xe5   :  { %v1214_v56 = vadd.f32 %v4189_v10, %v678_v47  ;;  %1517 = vperm.xlu1 %3233, %v1425_v43   ;;  %1512 = vperm.xlu0 %3232, %v1424_v46   ;;  %v1429_v43 = vld [vmem:[%s5147_s6 + $0x88] sm:$0xff]  ;;  %v1428_v46 = vld [vmem:[%s5147_s6 + $0x80] sm:$0xff] }
  0xe6   :  { %v1213_v5 = vadd.f32 %v4179_v0, %v673_v1  ;;  %v3059_v6 = vpop.f32.mrb[4].mxu0 }
  0xe7   :  { %3352 = vtanh.f32 %v1214_v56  ;;  %v688_v2 = vadd.f32 %v3059_v6, %v400_v58  ;;  %v682_v21 = vpop.f32.mrb[5].mxu0 }
  0xe8   :  { %3354 = vtanh.f32 %v1213_v5  ;;  %v683_v10 = vadd.f32 %v682_v21, %v399_v61  ;;  %v4291_v29 = vpop.permute.xlu1 %1063  ;;  %v4293_v59 = vpop.permute.xlu0 %1058  ;;  %v403_v61 = vmul.f32 %v4243_v50, %v4058_v12 }
  0xe9   :  { %v1216_v0 = vadd.f32 %v4199_v18, %v688_v2  ;;  %1527 = vperm.xlu1 %3233, %v1427_v13   ;;  %1522 = vperm.xlu0 %3232, %v1426_v14   ;;  %v1431_v13 = vld [vmem:[%s5147_s6 + $0x98] sm:$0xff] }
  0xea   :  { %v1215_v37 = vadd.f32 %v4187_v9, %v683_v10  ;;  %v3062_v38 = vpop.f32.mrb[6].mxu0  ;;  %v404_v9 = vmul.f32 %v4243_v50, %v4056_v11  ;;  %v1430_v11 = vld [vmem:[%s5147_s6 + $0x90] sm:$0xff] }
  0xeb   :  { %3356 = vtanh.f32 %v1216_v0  ;;  %v698_v7 = vadd.f32 %v3062_v38, %v402_v3  ;;  %v692_v47 = vpop.f32.mrb[7].mxu0  ;;  %v406_v3 = vmul.f32 %v4243_v50, %v4066_v15 }
  0xec   :  { %3358 = vtanh.f32 %v1215_v37  ;;  %v693_v18 = vadd.f32 %v692_v47, %v401_v30  ;;  %v4307_v62 = vpop.permute.xlu1 %1073  ;;  %v4309_v1 = vpop.permute.xlu0 %1068  ;;  %v405_v37 = vmul.f32 %v4243_v50, %v4068_v16  ;;  %v1432_v47 = vld [vmem:[%s5147_s6 + $0xa0] sm:$0xff] }
  0xed   :  { %v3349_v8 = vpop.eup %3348  ;;  %v1218_v58 = vadd.f32 %v4209_v26, %v698_v7  ;;  %1537 = vperm.xlu1 %3233, %v1429_v43   ;;  %1532 = vperm.xlu0 %3232, %v1428_v46   ;;  %v1433_v46 = vld [vmem:[%s5147_s6 + $0xa8] sm:$0xff] }
  0xee   :  { %v3351_v56 = vpop.eup %3350  ;;  %v1217_v5 = vadd.f32 %v4197_v17, %v693_v18  ;;  %v3065_v6 = vpop.f32.mrb[8].mxu0 }
  0xef   :  { %3360 = vtanh.f32 %v1218_v58  ;;  %v708_v14 = vadd.f32 %v3065_v6, %v404_v9  ;;  %v702_v2 = vpop.f32.mrb[9].mxu0  ;;  %v1387_v21 = vpack.c.bf16 %v3349_v8, %v3351_v56  ;;  %v408_v9 = vmul.f32 %v4243_v50, %v4076_v19 }
  0xf0   :  { %3362 = vtanh.f32 %v1217_v5  ;;  %v703_v26 = vadd.f32 %v702_v2, %v403_v61  ;;  %v4323_v10 = vpop.permute.xlu1 %1083  ;;  %v4325_v12 = vpop.permute.xlu0 %1078  ;;  %v407_v61 = vmul.f32 %v4243_v50, %v4078_v20  ;;  %v1434_v2 = vld [vmem:[%s5147_s6 + $0xb0] sm:$0xff] }
  0xf1   :  { %v3353_v17 = vpop.eup %3352  ;;  %v1220_v0 = vadd.f32 %v4219_v34, %v708_v14  ;;  %2059 = vmatpush1.bf16.msra.mxu1 %v1387_v21  ;;  %1547 = vperm.xlu1 %3233, %v1431_v13   ;;  %v1435_v13 = vld [vmem:[%s5147_s6 + $0xb8] sm:$0xff] }
  0xf2   :  { %v3355_v30 = vpop.eup %3354  ;;  %v1219_v38 = vadd.f32 %v4207_v25, %v703_v26  ;;  %1542 = vperm.xlu0 %3232, %v1430_v11   ;;  %v3068_v43 = vpop.f32.mrb[10].mxu0  ;;  %2060 = vmatprep.subr.bf16.mxu1 %v3553_v4  ;;  %v410_v26 = vmul.f32 %v4243_v50, %v4086_v23 }
  0xf3   :  { %3364 = vtanh.f32 %v1220_v0  ;;  %v718_v15 = vadd.f32 %v3068_v43, %v406_v3  ;;  %v712_v7 = vpop.f32.mrb[11].mxu0  ;;  %v1388_v34 = vpack.c.bf16 %v3353_v17, %v3355_v30  ;;  %v409_v0 = vmul.f32 %v4243_v50, %v4088_v24 }
  0xf4   :  { %3366 = vtanh.f32 %v1219_v38  ;;  %v713_v16 = vadd.f32 %v712_v7, %v405_v37  ;;  %v4340_v18 = vpop.permute.xlu1 %1093  ;;  %v4342_v25 = vpop.permute.xlu0 %1088  ;;  %v1437_v38 = vld [vmem:[%s5147_s6 + $0xc8] sm:$0xff] }
  0xf5   :  { %v3357_v8 = vpop.eup %3356  ;;  %v1222_v58 = vadd.f32 %v4229_v42, %v718_v15  ;;  %2061 = vmatpush1.bf16.msra.mxu1 %v1388_v34  ;;  %1557 = vperm.xlu1 %3233, %v1433_v46   ;;  %v1436_v46 = vld [vmem:[%s5147_s6 + $0xc0] sm:$0xff]  ;;  %v412_v34 = vmul.f32 %v4243_v50, %v4096_v27 }
  0xf6   :  { %v3359_v56 = vpop.eup %3358  ;;  %v1221_v5 = vadd.f32 %v4217_v33, %v713_v16  ;;  %1552 = vperm.xlu0 %3232, %v1432_v47   ;;  %v3071_v6 = vpop.f32.mrb[12].mxu0  ;;  %2062 = vmatprep.subr.bf16.mxu1 %v3553_v4 }
  0xf7   :  { %3368 = vtanh.f32 %v1222_v58  ;;  %v728_v19 = vadd.f32 %v3071_v6, %v408_v9  ;;  %v722_v14 = vpop.f32.mrb[13].mxu0  ;;  %v1389_v42 = vpack.c.bf16 %v3357_v8, %v3359_v56  ;;  %v411_v8 = vmul.f32 %v4243_v50, %v4098_v28  ;;  %v1439_v56 = vld [vmem:[%s5147_s6 + $0xd8] sm:$0xff] }
  0xf8   :  { %3370 = vtanh.f32 %v1221_v5  ;;  %v723_v20 = vadd.f32 %v722_v14, %v407_v61  ;;  %v4357_v21 = vpop.permute.xlu1 %296  ;;  %v4359_v33 = vpop.permute.xlu0 %1098  ;;  %v1438_v5 = vld [vmem:[%s5147_s6 + $0xd0] sm:$0xff] }
  0xf9   :  { %v3361_v11 = vpop.eup %3360  ;;  %v1224_v17 = vadd.f32 %v4248_v54, %v728_v19  ;;  %2063 = vmatpush1.bf16.msra.mxu1 %v1389_v42  ;;  %1567 = vperm.xlu1 %3233, %v1435_v13   ;;  %v414_v19 = vmul.f32 %v4243_v50, %v4106_v31 }
  0xfa   :  { %v3363_v3 = vpop.eup %3362  ;;  %v1223_v30 = vadd.f32 %v4227_v39, %v723_v20  ;;  %1562 = vperm.xlu0 %3232, %v1434_v2   ;;  %v3074_v37 = vpop.f32.mrb[14].mxu0  ;;  %2064 = vmatprep.subr.bf16.mxu1 %v3553_v4  ;;  %v413_v2 = vmul.f32 %v4243_v50, %v4108_v32 }
  0xfb   :  { %3372 = vtanh.f32 %v1224_v17  ;;  %v738_v23 = vadd.f32 %v3074_v37, %v410_v26  ;;  %v732_v43 = vpop.f32.mrb[15].mxu0  ;;  %v1390_v54 = vpack.c.bf16 %v3361_v11, %v3363_v3  ;;  %v1441_v26 = vld [vmem:[%s5147_s6 + $0xe8] sm:$0xff]  ;;  %v1440_v3 = vld [vmem:[%s5147_s6 + $0xe0] sm:$0xff]  ;;  %v416_v37 = vmul.f32 %v4243_v50, %v4116_v35 }
  0xfc   :  { %3374 = vtanh.f32 %v1223_v30  ;;  %v733_v24 = vadd.f32 %v732_v43, %v409_v0  ;;  %v4374_v15 = vpop.permute.xlu1 %1108  ;;  %v4376_v39 = vpop.permute.xlu0 %1103  ;;  %v415_v43 = vmul.f32 %v4243_v50, %v4118_v36 }
  0xfd   :  { %v3365_v7 = vpop.eup %3364  ;;  %v1226_v47 = vadd.f32 %v4262_v63, %v738_v23  ;;  %2065 = vmatpush1.bf16.msra.mxu1 %v1390_v54  ;;  %1577 = vperm.xlu1 %3233, %v1437_v38  }
  0xfe   :  { %v3367_v16 = vpop.eup %3366  ;;  %v1225_v9 = vadd.f32 %v4246_v51, %v733_v24  ;;  %1572 = vperm.xlu0 %3232, %v1436_v46   ;;  %v3077_v58 = vpop.f32.mrb[16].mxu0  ;;  %2066 = vmatprep.subr.bf16.mxu1 %v3553_v4  ;;  %v1443_v24 = vld [vmem:[%s5147_s6 + $0xf8] sm:$0xff] }
  0xff   :  { %3376 = vtanh.f32 %v1226_v47  ;;  %v748_v27 = vadd.f32 %v3077_v58, %v412_v34  ;;  %v742_v61 = vpop.f32.mrb[17].mxu0  ;;  %v1391_v63 = vpack.c.bf16 %v3365_v7, %v3367_v16  ;;  %v1442_v34 = vld [vmem:[%s5147_s6 + $0xf0] sm:$0xff] }
 0x100   :  { %3378 = vtanh.f32 %v1225_v9  ;;  %v743_v28 = vadd.f32 %v742_v61, %v411_v8  ;;  %v4391_v6 = vpop.permute.xlu1 %306  ;;  %v4393_v51 = vpop.permute.xlu0 %301  ;;  %v418_v8 = vmul.f32 %v4243_v50, %v4129_v40 }
 0x101   :  { %v3369_v13 = vpop.eup %3368  ;;  %v1228_v14 = vadd.f32 %v4277_v60, %v748_v27  ;;  %2067 = vmatpush1.bf16.msra.mxu1 %v1391_v63  ;;  %1587 = vperm.xlu1 %3233, %v1439_v56   ;;  %v417_v56 = vmul.f32 %v4243_v50, %v4131_v41  ;;  %v2467_v63 = vld [vmem:[%s5148_s7 + $0x8] sm:$0xff] }
 0x102   :  { %v3371_v42 = vpop.eup %3370  ;;  %v1227_v20 = vadd.f32 %v4260_v22, %v743_v28  ;;  %1582 = vperm.xlu0 %3232, %v1438_v5   ;;  %v3080_v11 = vpop.f32.mrb[18].mxu0  ;;  %2068 = vmatprep.subr.bf16.mxu1 %v3553_v4  ;;  %v2466_v28 = vld [vmem:[%s5148_s7] sm:$0xff] }
 0x103   :  { %3380 = vtanh.f32 %v1228_v14  ;;  %v758_v31 = vadd.f32 %v3080_v11, %v414_v19  ;;  %v752_v17 = vpop.f32.mrb[19].mxu0  ;;  %v1392_v60 = vpack.c.bf16 %v3369_v13, %v3371_v42  ;;  %v420_v14 = vmul.f32 %v4243_v50, %v4139_v44 }
 0x104   :  { %3382 = vtanh.f32 %v1227_v20  ;;  %v753_v32 = vadd.f32 %v752_v17, %v413_v2  ;;  %v4408_v0 = vpop.permute.xlu1 %1118  ;;  %v4410_v22 = vpop.permute.xlu0 %1113  ;;  %v419_v20 = vmul.f32 %v4243_v50, %v4141_v45 }
 0x105   :  { %v3373_v30 = vpop.eup %3372  ;;  %v1230_v38 = vadd.f32 %v4293_v59, %v758_v31  ;;  %2069 = vmatpush1.bf16.msra.mxu1 %v1392_v60  ;;  %1597 = vperm.xlu1 %3233, %v1441_v26   ;;  %v2469_v31 = vld [vmem:[%s5148_s7 + $0x18] sm:$0xff]  ;;  %v2468_v60 = vld [vmem:[%s5148_s7 + $0x10] sm:$0xff] }
 0x106   :  { %v3375_v23 = vpop.eup %3374  ;;  %v1229_v54 = vadd.f32 %v4275_v55, %v753_v32  ;;  %1592 = vperm.xlu0 %3232, %v1440_v3   ;;  %v3083_v46 = vpop.f32.mrb[20].mxu0  ;;  %2070 = vmatprep.subr.bf16.mxu1 %v3553_v4 }
 0x107   :  { %3384 = vtanh.f32 %v1230_v38  ;;  %v768_v35 = vadd.f32 %v3083_v46, %v416_v37  ;;  %v762_v7 = vpop.f32.mrb[21].mxu0  ;;  %v1393_v59 = vpack.c.bf16 %v3373_v30, %v3375_v23  ;;  %v422_v30 = vmul.f32 %v4243_v50, %v4149_v48  ;;  %v2471_v46 = vld [vmem:[%s5148_s7 + $0x28] sm:$0xff] }
 0x108   :  { %3386 = vtanh.f32 %v1229_v54  ;;  %v763_v36 = vadd.f32 %v762_v7, %v415_v43  ;;  %v4425_v47 = vpop.permute.xlu1 %316  ;;  %v4427_v55 = vpop.permute.xlu0 %311  ;;  %v421_v23 = vmul.f32 %v4243_v50, %v4151_v49 }
 0x109   :  { %v3377_v16 = vpop.eup %3376  ;;  %v1232_v9 = vadd.f32 %v4309_v1, %v768_v35  ;;  %2071 = vmatpush1.bf16.msra.mxu1 %v1393_v59  ;;  %1607 = vperm.xlu1 %3233, %v1443_v24   ;;  %v2470_v35 = vld [vmem:[%s5148_s7 + $0x20] sm:$0xff] }
 0x10a   :  { %v3379_v58 = vpop.eup %3378  ;;  %v1231_v27 = vadd.f32 %v4291_v29, %v763_v36  ;;  %1602 = vperm.xlu0 %3232, %v1442_v34   ;;  %v3086_v61 = vpop.f32.mrb[22].mxu0  ;;  %2072 = vmatprep.subr.bf16.mxu1 %v3553_v4  ;;  %v424_v34 = vmul.f32 %v4243_v50, %v4159_v52 }
 0x10b   :  { %3388 = vtanh.f32 %v1232_v9  ;;  %v778_v40 = vadd.f32 %v3086_v61, %v418_v8  ;;  %v772_v5 = vpop.f32.mrb[23].mxu0  ;;  %v1394_v1 = vpack.c.bf16 %v3377_v16, %v3379_v58  ;;  %v423_v8 = vmul.f32 %v4243_v50, %v4161_v53  ;;  %v2472_v61 = vld [vmem:[%s5148_s7 + $0x30] sm:$0xff] }
 0x10c   :  { %3390 = vtanh.f32 %v1231_v27  ;;  %v773_v41 = vadd.f32 %v772_v5, %v417_v56  ;;  %v4442_v13 = vpop.permute.xlu1 %1128  ;;  %v4444_v29 = vpop.permute.xlu0 %1123  ;;  %v2473_v56 = vld [vmem:[%s5148_s7 + $0x38] sm:$0xff]  ;;  %v426_v5 = vmul.f32 %v4243_v50, %v4357_v21 }
 0x10d   :  { %v3381_v19 = vpop.eup %3380  ;;  %v1234_v42 = vadd.f32 %v4325_v12, %v778_v40  ;;  %2073 = vmatpush1.bf16.msra.mxu1 %v1394_v1  ;;  %2511 = vperm.xlu1 %3233, %v2467_v63  }
 0x10e   :  { %v3383_v2 = vpop.eup %3382  ;;  %v1233_v11 = vadd.f32 %v4307_v62, %v773_v41  ;;  %2506 = vperm.xlu0 %3232, %v2466_v28   ;;  %v3089_v26 = vpop.f32.mrb[24].mxu0  ;;  %2074 = vmatprep.subr.bf16.mxu1 %v3553_v4  ;;  %v425_v41 = vmul.f32 %v4243_v50, %v4171_v57 }
 0x10f   :  { %3392 = vtanh.f32 %v1234_v42  ;;  %v788_v44 = vadd.f32 %v3089_v26, %v420_v14  ;;  %v782_v17 = vpop.f32.mrb[25].mxu0  ;;  %v1395_v12 = vpack.c.bf16 %v3381_v19, %v3383_v2  ;;  %v2475_v42 = vld [vmem:[%s5148_s7 + $0x48] sm:$0xff] }
 0x110   :  { %3394 = vtanh.f32 %v1233_v11  ;;  %v783_v45 = vadd.f32 %v782_v17, %v419_v20  ;;  %v4459_v3 = vpop.permute.xlu1 %326  ;;  %v4461_v62 = vpop.permute.xlu0 %321  ;;  %v2474_v20 = vld [vmem:[%s5148_s7 + $0x40] sm:$0xff] }
 0x111   :  { %v3385_v32 = vpop.eup %3384  ;;  %v1236_v37 = vadd.f32 %v4342_v25, %v788_v44  ;;  %2075 = vmatpush1.bf16.msra.mxu1 %v1395_v12  ;;  %2521 = vperm.xlu1 %3233, %v2469_v31   ;;  %v428_v31 = vmul.f32 %v4243_v50, %v4391_v6  ;;  %v427_v12 = vmul.f32 %v4243_v50, %v4393_v51 }
 0x112   :  { %v3387_v38 = vpop.eup %3386  ;;  %v1235_v43 = vadd.f32 %v4323_v10, %v783_v45  ;;  %2516 = vperm.xlu0 %3232, %v2468_v60   ;;  %v3092_v54 = vpop.f32.mrb[26].mxu0  ;;  %2076 = vmatprep.subr.bf16.mxu1 %v3553_v4 }
 0x113   :  { %3396 = vtanh.f32 %v1236_v37  ;;  %v798_v48 = vadd.f32 %v3092_v54, %v422_v30  ;;  %v792_v24 = vpop.f32.mrb[27].mxu0  ;;  %v1396_v25 = vpack.c.bf16 %v3385_v32, %v3387_v38  ;;  %v2477_v32 = vld [vmem:[%s5148_s7 + $0x58] sm:$0xff]  ;;  %v2476_v37 = vld [vmem:[%s5148_s7 + $0x50] sm:$0xff] }
 0x114   :  { %3398 = vtanh.f32 %v1235_v43  ;;  %v793_v49 = vadd.f32 %v792_v24, %v421_v23  ;;  %v4476_v7 = vpop.permute.xlu1 %1138  ;;  %v4478_v10 = vpop.permute.xlu0 %1133  ;;  %v430_v43 = vmul.f32 %v4243_v50, %v4425_v47 }
 0x115   :  { %v3389_v59 = vpop.eup %3388  ;;  %v1238_v36 = vadd.f32 %v4359_v33, %v798_v48  ;;  %2077 = vmatpush1.bf16.msra.mxu1 %v1396_v25  ;;  %2531 = vperm.xlu1 %3233, %v2471_v46   ;;  %v429_v48 = vmul.f32 %v4243_v50, %v4427_v55 }
 0x116   :  { %v3391_v16 = vpop.eup %3390  ;;  %v1237_v9 = vadd.f32 %v4340_v18, %v793_v49  ;;  %2526 = vperm.xlu0 %3232, %v2470_v35   ;;  %v3095_v58 = vpop.f32.mrb[28].mxu0  ;;  %2078 = vmatprep.subr.bf16.mxu1 %v3553_v4  ;;  %v2479_v35 = vld [vmem:[%s5148_s7 + $0x68] sm:$0xff] }
 0x117   :  { %3400 = vtanh.f32 %v1238_v36  ;;  %v808_v52 = vadd.f32 %v3095_v58, %v424_v34  ;;  %v802_v27 = vpop.f32.mrb[29].mxu0  ;;  %v1397_v33 = vpack.c.bf16 %v3389_v59, %v3391_v16  ;;  %v2478_v59 = vld [vmem:[%s5148_s7 + $0x60] sm:$0xff]  ;;  %v432_v16 = vmul.f32 %v4243_v50, %v4459_v3 }
 0x118   :  { %3402 = vtanh.f32 %v1237_v9  ;;  %v803_v53 = vadd.f32 %v802_v27, %v423_v8  ;;  %v4493_v63 = vpop.permute.xlu1 %336  ;;  %v4495_v18 = vpop.permute.xlu0 %331  ;;  %v431_v58 = vmul.f32 %v4243_v50, %v4461_v62  ;;  %v2481_v27 = vld [vmem:[%s5148_s7 + $0x78] sm:$0xff] }
 0x119   :  { %v3393_v40 = vpop.eup %3392  ;;  %v1240_v1 = vadd.f32 %v4374_v15, %v808_v52  ;;  %2079 = vmatpush1.bf16.msra.mxu1 %v1397_v33  ;;  %2541 = vperm.xlu1 %3233, %v2473_v56  }
 0x11a   :  { %v3395_v28 = vpop.eup %3394  ;;  %v1239_v19 = vadd.f32 %v4376_v39, %v803_v53  ;;  %2536 = vperm.xlu0 %3232, %v2472_v61   ;;  %v3098_v14 = vpop.f32.mrb[30].mxu0  ;;  %2080 = vmatprep.subr.bf16.mxu1 %v3553_v4  ;;  %v2480_v61 = vld [vmem:[%s5148_s7 + $0x70] sm:$0xff] }
 0x11b   :  { %3404 = vtanh.f32 %v1240_v1  ;;  %v818_v21 = vadd.f32 %v3098_v14, %v426_v5  ;;  %v812_v2 = vpop.f32.mrb[31].mxu0  ;;  %v1398_v15 = vpack.c.bf16 %v3393_v40, %v3395_v28  ;;  %v434_v5 = vmul.f32 %v4243_v50, %v4493_v63 }
 0x11c   :  { %3406 = vtanh.f32 %v1239_v19  ;;  %v813_v57 = vadd.f32 %v812_v2, %v425_v41  ;;  %v4510_v11 = vpop.permute.xlu1 %1148  ;;  %v4512_v39 = vpop.permute.xlu0 %1143  ;;  %v433_v41 = vmul.f32 %v4243_v50, %v4495_v18 }
 0x11d   :  { %v3397_v26 = vpop.eup %3396  ;;  %v1242_v44 = vadd.f32 %v4408_v0, %v818_v21  ;;  %2081 = vmatpush1.bf16.msra.mxu1 %v1398_v15  ;;  %2551 = vperm.xlu1 %3233, %v2475_v42   ;;  %v2483_v42 = vld [vmem:[%s5148_s7 + $0x88] sm:$0xff]  ;;  %v2482_v15 = vld [vmem:[%s5148_s7 + $0x80] sm:$0xff] }
 0x11e   :  { %v3399_v17 = vpop.eup %3398  ;;  %v1241_v60 = vadd.f32 %v4410_v22, %v813_v57  ;;  %2546 = vperm.xlu0 %3232, %v2474_v20   ;;  %v3101_v45 = vpop.f32.mrb[32].mxu0  ;;  %2082 = vmatprep.subr.bf16.mxu1 %v3553_v4 }
 0x11f   :  { %3408 = vtanh.f32 %v1242_v44  ;;  %v828_v6 = vadd.f32 %v3101_v45, %v428_v31  ;;  %v822_v30 = vpop.f32.mrb[33].mxu0  ;;  %v1399_v0 = vpack.c.bf16 %v3397_v26, %v3399_v17 }
 0x120   :  { %3410 = vtanh.f32 %v1241_v60  ;;  %v823_v51 = vadd.f32 %v822_v30, %v427_v12  ;;  %v4527_v38 = vpop.permute.xlu1 %346  ;;  %v4529_v22 = vpop.permute.xlu0 %341  ;;  %v2485_v30 = vld [vmem:[%s5148_s7 + $0x98] sm:$0xff] }
 0x121   :  { %v3401_v23 = vpop.eup %3400  ;;  %v1244_v54 = vadd.f32 %v4442_v13, %v828_v6  ;;  %2083 = vmatpush1.bf16.msra.mxu1 %v1399_v0  ;;  %2561 = vperm.xlu1 %3233, %v2477_v32   ;;  %v436_v26 = vmul.f32 %v4243_v50, %v4527_v38  ;;  %v435_v17 = vmul.f32 %v4243_v50, %v4529_v22  ;;  %v2484_v0 = vld [vmem:[%s5148_s7 + $0x90] sm:$0xff] }
 0x122   :  { %v3403_v46 = vpop.eup %3402  ;;  %v1243_v24 = vadd.f32 %v4444_v29, %v823_v51  ;;  %2556 = vperm.xlu0 %3232, %v2476_v37   ;;  %v3104_v25 = vpop.f32.mrb[34].mxu0  ;;  %2084 = vmatprep.subr.bf16.mxu1 %v3553_v4  ;;  %v3237_v22 = vld [vmem:[%s5146_s5 + $0x24] ss:$16 sps:$4 sm:$0xff]  }
 0x123   :  { %3412 = vtanh.f32 %v1244_v54  ;;  %v838_v47 = vadd.f32 %v3104_v25, %v430_v43  ;;  %v832_v49 = vpop.f32.mrb[35].mxu0  ;;  %v1400_v13 = vpack.c.bf16 %v3401_v23, %v3403_v46 }
 0x124   :  { %3414 = vtanh.f32 %v1243_v24  ;;  %v833_v55 = vadd.f32 %v832_v49, %v429_v48  ;;  %v1159_v34 = vpop.permute.xlu1 %1158  ;;  %v1154_v29 = vpop.permute.xlu0 %1153 }
 0x125   :  { %v3405_v36 = vpop.eup %3404  ;;  %v1246_v8 = vadd.f32 %v4476_v7, %v838_v47  ;;  %2085 = vmatpush1.bf16.msra.mxu1 %v1400_v13  ;;  %2571 = vperm.xlu1 %3233, %v2479_v35   ;;  %v2487_v13 = vld [vmem:[%s5148_s7 + $0xa8] sm:$0xff] }
 0x126   :  { %v3407_v9 = vpop.eup %3406  ;;  %v1245_v56 = vadd.f32 %v4478_v10, %v833_v55  ;;  %2566 = vperm.xlu0 %3232, %v2478_v59   ;;  %v3107_v52 = vpop.f32.mrb[36].mxu0  ;;  %2086 = vmatprep.subr.bf16.mxu1 %v3553_v4  ;;  %v2486_v59 = vld [vmem:[%s5148_s7 + $0xa0] sm:$0xff] }
 0x127   :  { %3416 = vtanh.f32 %v1246_v8  ;;  %v848_v3 = vadd.f32 %v3107_v52, %v432_v16  ;;  %v842_v33 = vpop.f32.mrb[37].mxu0  ;;  %v1401_v7 = vpack.c.bf16 %v3405_v36, %v3407_v9  ;;  %v3239_v36 = vld [vmem:[%s5146_s5 + $0x20] ss:$16 sps:$4 sm:$0xff]  }
 0x128   :  { %3418 = vtanh.f32 %v1245_v56  ;;  %v843_v62 = vadd.f32 %v842_v33, %v431_v58  ;;  %v357_v53 = vpop.permute.xlu1 %356  ;;  %v352_v10 = vpop.permute.xlu0 %351  ;;  %v2488_v33 = vld [vmem:[%s5148_s7 + $0xb0] sm:$0xff] }
 0x129   :  { %v3409_v40 = vpop.eup %3408  ;;  %v1248_v1 = vadd.f32 %v4510_v11, %v848_v3  ;;  %2087 = vmatpush1.bf16.msra.mxu1 %v1401_v7  ;;  %2581 = vperm.xlu1 %3233, %v2481_v27   ;;  %v3234_v11 = vld [vmem:[%s5146_s5] ss:$16 sps:$4 sm:$0xff]   ;;  %v438_v43 = vmul.f32 %v4243_v50, %v357_v53  ;;  %v437_v48 = vmul.f32 %v4243_v50, %v352_v10  ;;  %v2489_v3 = vld [vmem:[%s5148_s7 + $0xb8] sm:$0xff] }
 0x12a   :  { %v3411_v28 = vpop.eup %3410  ;;  %v1247_v19 = vadd.f32 %v4512_v39, %v843_v62  ;;  %2576 = vperm.xlu0 %3232, %v2480_v61   ;;  %v3110_v14 = vpop.f32.mrb[38].mxu0  ;;  %2088 = vmatprep.subr.bf16.mxu1 %v3553_v4  ;;  %v3240_v62 = vld [vmem:[%s5146_s5 + $0x44] ss:$16 sps:$4 sm:$0xff]  }
 0x12b   :  { %3420 = vtanh.f32 %v1248_v1  ;;  %v858_v63 = vadd.f32 %v3110_v14, %v434_v5  ;;  %v852_v21 = vpop.f32.mrb[39].mxu0  ;;  %v1402_v2 = vpack.c.bf16 %v3409_v40, %v3411_v28 }
 0x12c   :  { %3422 = vtanh.f32 %v1247_v19  ;;  %v853_v18 = vadd.f32 %v852_v21, %v433_v41  ;;  %v1169_v20 = vpop.permute.xlu1 %1168  ;;  %v1164_v57 = vpop.permute.xlu0 %1163 }
 0x12d   :  { %v3413_v39 = vpop.eup %3412  ;;  %v1250_v31 = vadd.f32 %v1159_v34, %v858_v63  ;;  %2089 = vmatpush1.bf16.msra.mxu1 %v1402_v2  ;;  %2591 = vperm.xlu1 %3233, %v2483_v42   ;;  %v2491_v42 = vld [vmem:[%s5148_s7 + $0xc8] sm:$0xff]  ;;  %v2490_v63 = vld [vmem:[%s5148_s7 + $0xc0] sm:$0xff] }
 0x12e   :  { %v3415_v44 = vpop.eup %3414  ;;  %v1249_v12 = vadd.f32 %v1154_v29, %v853_v18  ;;  %2586 = vperm.xlu0 %3232, %v2482_v15   ;;  %v3113_v60 = vpop.f32.mrb[40].mxu0  ;;  %3130 = vmatprep.subr.bf16.mxu1 %v3553_v4  ;;  %v3242_v15 = vld [vmem:[%s5146_s5 + $0x40] ss:$16 sps:$4 sm:$0xff]  }
 0x12f   :  { %3424 = vtanh.f32 %v1250_v31  ;;  %v868_v45 = vadd.f32 %v3113_v60, %v436_v26  ;;  %v862_v32 = vpop.f32.mrb[41].mxu0  ;;  %v1403_v6 = vpack.c.bf16 %v3413_v39, %v3415_v44 }
 0x130   :  { %3426 = vtanh.f32 %v1249_v12  ;;  %v863_v37 = vadd.f32 %v862_v32, %v435_v17  ;;  %2091 = vmatmul.mubr.bf16.vlgmr.msra.gmra.mrb[0].mxu1 %v3234_v11  ;;  %v367_v51 = vpop.permute.xlu1 %366  ;;  %v362_v38 = vpop.permute.xlu0 %361  ;;  %v2492_v17 = vld [vmem:[%s5148_s7 + $0xd0] sm:$0xff]  ;;  %v1444_v12 = vld [vmem:[%s5147_s6 + $0x100] sm:$0xff] }
 0x131   :  { %v3417_v23 = vpop.eup %3416  ;;  %v1252_v54 = vadd.f32 %v1169_v20, %v868_v45  ;;  %2244 = vmatpush1.bf16.msra.mxu0 %v1403_v6  ;;  %3139 = vmatpush1.bf16.msra.mxu1 %v1403_v6  ;;  %v440_v10 = vmul.f32 %v4243_v50, %v367_v51  ;;  %v439_v40 = vmul.f32 %v4243_v50, %v362_v38  ;;  %v3243_v32 = vld [vmem:[%s5146_s5 + $0x64] ss:$16 sps:$4 sm:$0xff]   ;;  %v3528_v51 = vld [vmem:[%s5142_s1] ss:$0 sm:$0xff] }
 0x132   :  { %v3419_v46 = vpop.eup %3418  ;;  %v1251_v24 = vadd.f32 %v1164_v57, %v863_v37  ;;  %2601 = vperm.xlu1 %3233, %v2485_v30   ;;  %2596 = vperm.xlu0 %3232, %v2484_v0   ;;  %v3116_v25 = vpop.f32.mrb[42].mxu0 }
 0x133   :  { %3428 = vtanh.f32 %v1252_v54  ;;  %v878_v35 = vadd.f32 %v3116_v25, %v438_v43  ;;  %v872_v47 = vpop.f32.mrb[43].mxu0  ;;  %2245 = vmatprep.subr.bf16.mxu0 %v3553_v4  ;;  %3131 = vmatprep.subr.bf16.mxu1 %v3553_v4  ;;  %v1404_v49 = vpack.c.bf16 %v3417_v23, %v3419_v46  ;;  %v2493_v43 = vld [vmem:[%s5148_s7 + $0xd8] sm:$0xff]  ;;  %v1445_v54 = vld [vmem:[%s5147_s6 + $0x108] sm:$0xff] }
 0x134   :  { %3430 = vtanh.f32 %v1251_v24  ;;  %v873_v55 = vadd.f32 %v872_v47, %v437_v48  ;;  %v1179_v34 = vpop.permute.xlu1 %1178  ;;  %v1174_v29 = vpop.permute.xlu0 %1173  ;;  %2098 = vmatprep.mubr.bf16.mxu1 %v3237_v22  ;;  %v3245_v24 = vld [vmem:[%s5146_s5 + $0x60] ss:$16 sps:$4 sm:$0xff]   ;;  %v3246_v47 = vld [vmem:[%s5146_s5 + $0x84] ss:$16 sps:$4 sm:$0xff]  }
 0x135   :  { %v3421_v16 = vpop.eup %3420  ;;  %v1254_v8 = vadd.f32 %v1179_v34, %v878_v35  ;;  %2246 = vmatpush1.bf16.msra.mxu0 %v1404_v49  ;;  %3140 = vmatpush1.bf16.msra.mxu1 %v1404_v49 }
 0x136   :  { %v3423_v9 = vpop.eup %3422  ;;  %v1253_v58 = vadd.f32 %v1174_v29, %v873_v55  ;;  %2611 = vperm.xlu1 %3233, %v2487_v13   ;;  %2606 = vperm.xlu0 %3232, %v2486_v59   ;;  %v3119_v56 = vpop.f32.mrb[44].mxu0  ;;  %v2494_v59 = vld [vmem:[%s5148_s7 + $0xe0] sm:$0xff]  ;;  %v1446_v55 = vld [vmem:[%s5147_s6 + $0x110] sm:$0xff] }
 0x137   :  { %3432 = vtanh.f32 %v1254_v8  ;;  %v882_v52 = vpop.f32.mrb[45].mxu0  ;;  %2247 = vmatprep.subr.bf16.mxu0 %v3553_v4  ;;  %3132 = vmatprep.subr.bf16.mxu1 %v3553_v4  ;;  %v1405_v27 = vpack.c.bf16 %v3421_v16, %v3423_v9  ;;  %v888_v28 = vadd.f32 %v3119_v56, %v440_v10  ;;  %v2495_v56 = vld [vmem:[%s5148_s7 + $0xe8] sm:$0xff]  ;;  %v2497_v10 = vld [vmem:[%s5148_s7 + $0xf8] sm:$0xff] }
 0x138   :  { %3434 = vtanh.f32 %v1253_v58  ;;  %2099 = vmatmul.mubr.bf16.gmra.mrb[4].mxu1 %v3239_v36  ;;  %v377_v7 = vpop.permute.xlu1 %376  ;;  %v372_v61 = vpop.permute.xlu0 %371  ;;  %v883_v41 = vadd.f32 %v882_v52, %v439_v40  ;;  %v1447_v52 = vld [vmem:[%s5147_s6 + $0x118] sm:$0xff]  ;;  %v1449_v40 = vld [vmem:[%s5147_s6 + $0x128] sm:$0xf] }
 0x139   :  { %v3425_v53 = vpop.eup %3424  ;;  %2248 = vmatpush1.bf16.msra.mxu0 %v1405_v27  ;;  %3141 = vmatpush1.bf16.msra.mxu1 %v1405_v27  ;;  %v442_v39 = vmul.f32 %v4243_v50, %v377_v7  ;;  %v441_v26 = vmul.f32 %v4243_v50, %v372_v61  ;;  %v3248_v27 = vld [vmem:[%s5146_s5 + $0x80] ss:$16 sps:$4 sm:$0xff]  }
 0x13a   :  { %v3427_v5 = vpop.eup %3426  ;;  %2621 = vperm.xlu1 %3233, %v2489_v3   ;;  %2616 = vperm.xlu0 %3232, %v2488_v33   ;;  %v3122_v1 = vpop.f32.mrb[46].mxu0  ;;  %v3249_v3 = vld [vmem:[%s5146_s5 + $0xa4] ss:$16 sps:$4 sm:$0xff]  }
 0x13b   :  { %v892_v19 = vpop.f32.mrb[47].mxu0  ;;  %2249 = vmatprep.subr.bf16.mxu0 %v3553_v4  ;;  %3133 = vmatprep.subr.bf16.mxu1 %v3553_v4  ;;  %v1406_v14 = vpack.c.bf16 %v3425_v53, %v3427_v5  ;;  %v898_v0 = vadd.f32 %v3122_v1, %v442_v39  ;;  %v2496_v33 = vld [vmem:[%s5148_s7 + $0xf0] sm:$0xff]  ;;  %v1448_v7 = vld [vmem:[%s5147_s6 + $0x120] sm:$0xff]  ;;  %v3264_v39 = vld [vmem:[%s5146_s5 + $0x4c] ss:$16 sps:$4 sm:$0xff]  }
 0x13c   :  { %v1189_v21 = vpop.permute.xlu1 %1188  ;;  %v1184_v2 = vpop.permute.xlu0 %1183  ;;  %2106 = vmatprep.mubr.bf16.mxu1 %v3240_v62  ;;  %v893_v37 = vadd.f32 %v892_v19, %v441_v26  ;;  %v3251_v5 = vld [vmem:[%s5146_s5 + $0xa0] ss:$16 sps:$4 sm:$0xff]   ;;  %v2499_v19 = vld [vmem:[%s5148_s7 + $0x108] sm:$0xff] }
 0x13d   :  { %v3429_v18 = vpop.eup %3428  ;;  %v1256_v20 = vadd.f32 %v1189_v21, %v888_v28  ;;  %v1255_v57 = vadd.f32 %v1184_v2, %v883_v41  ;;  %2250 = vmatpush1.bf16.msra.mxu0 %v1406_v14  ;;  %3142 = vmatpush1.bf16.msra.mxu1 %v1406_v14  ;;  %v2498_v14 = vld [vmem:[%s5148_s7 + $0x100] sm:$0xff]  ;;  %v2501_v21 = vld [vmem:[%s5148_s7 + $0x118] sm:$0xff]  ;;  %v2500_v2 = vld [vmem:[%s5148_s7 + $0x110] sm:$0xff] }
 0x13e   :  { %v3431_v11 = vpop.eup %3430  ;;  %2631 = vperm.xlu1 %3233, %v2491_v42   ;;  %2626 = vperm.xlu0 %3232, %v2490_v63   ;;  %v3125_v31 = vpop.f32.mrb[48].mxu0  ;;  %v3255_v42 = vld [vmem:[%s5146_s5 + $0xc4] ss:$16 sps:$4 sm:$0xff]   ;;  %v3252_v63 = vld [vmem:[%s5146_s5 + $0x8] ss:$16 sps:$4 sm:$0xff]  }
 0x13f   :  { %3436 = vtanh.f32 %v1256_v20  ;;  %2251 = vmatprep.subr.bf16.mxu0 %v3553_v4  ;;  %3134 = vmatprep.subr.bf16.mxu1 %v3553_v4  ;;  %v1407_v44 = vpack.c.bf16 %v3429_v18, %v3431_v11  ;;  %v902_v60 = vpop.f32.mrb[49].mxu0  ;;  %v3261_v18 = vld [vmem:[%s5146_s5 + $0xe4] ss:$16 sps:$4 sm:$0xff]   ;;  %v2503_v20 = vld [vmem:[%s5148_s7 + $0x128] sm:$0xf] }
 0x140   :  { %3438 = vtanh.f32 %v1255_v57  ;;  %2107 = vmatmul.mubr.bf16.gmra.mrb[8].mxu1 %v3242_v15  ;;  %v387_v50 = vpop.permute.xlu1 %386  ;;  %v382_v45 = vpop.permute.xlu0 %381  ;;  %v3257_v15 = vld [vmem:[%s5146_s5 + $0xc0] ss:$16 sps:$4 sm:$0xff]   ;;  %v3260_v11 = vld [vmem:[%s5146_s5 + $0x28] ss:$16 sps:$4 sm:$0xff]  }
 0x141   :  { %v3433_v6 = vpop.eup %3432  ;;  %2252 = vmatpush1.bf16.msra.mxu0 %v1407_v44  ;;  %3143 = vmatpush1.bf16.msra.mxu1 %v1407_v44  ;;  %v444_v38 = vmul.f32 %v3528_v51, %v387_v50  ;;  %v443_v22 = vmul.f32 %v3528_v51, %v382_v45  ;;  %v2502_v57 = vld [vmem:[%s5148_s7 + $0x120] sm:$0xff]  ;;  %v3272_v45 = vld [vmem:[%s5146_s5 + $0x68] ss:$16 sps:$4 sm:$0xff]  }
 0x142   :  { %v3435_v30 = vpop.eup %3434  ;;  %2636 = vperm.xlu1 %3233, %v2492_v17   ;;  %1612 = vperm.xlu0 %3232, %v1444_v12   ;;  %v2815_v26 = vld [vmem:[#allocation2] sm:$0x1]  ;;  %v3267_v44 = vld [vmem:[%s5146_s5 + $0x104] ss:$16 sps:$4 sm:$0xff]   ;;  %v3266_v17 = vld [vmem:[%s5146_s5 + $0x48] ss:$16 sps:$4 sm:$0xff]  }
 0x143   :  { %2253 = vmatprep.subr.bf16.mxu0 %v3553_v4  ;;  %3135 = vmatprep.subr.bf16.mxu1 %v3553_v4  ;;  %v1408_v23 = vpack.c.bf16 %v3433_v6, %v3435_v30  ;;  %v908_v49 = vadd.f32 %v3125_v31, %v444_v38  ;;  %v903_v13 = vadd.f32 %v902_v60, %v443_v22  ;;  %v3263_v31 = vld [vmem:[%s5146_s5 + $0xe0] ss:$16 sps:$4 sm:$0xff]   ;;  %v3270_v12 = vld [vmem:[%s5146_s5 + $0x6c] ss:$16 sps:$4 sm:$0xff]   ;;  %v3273_v50 = vld [vmem:[%s5146_s5 + $0x124] ss:$16 sps:$4 sm:$0xff]  }
 0x144   :  { %v1199_v46 = vpop.permute.xlu1 %1198  ;;  %v1194_v48 = vpop.permute.xlu0 %1193  ;;  %2114 = vmatprep.mubr.bf16.mxu1 %v3243_v32  ;;  %v3269_v60 = vld [vmem:[%s5146_s5 + $0x100] ss:$16 sps:$4 sm:$0xff]   ;;  %v3276_v32 = vld [vmem:[%s5146_s5 + $0x8c] ss:$16 sps:$4 sm:$0xff]   ;;  %v3279_v30 = vld [vmem:[%s5146_s5 + $0x144] ss:$16 sps:$4 sm:$0xff]  }
 0x145   :  { %v1258_v25 = vadd.f32 %v1199_v46, %v898_v0  ;;  %v1257_v35 = vadd.f32 %v1194_v48, %v893_v37  ;;  %2254 = vmatpush1.bf16.msra.mxu0 %v1408_v23  ;;  %3144 = vmatpush1.bf16.msra.mxu1 %v1408_v23  ;;  %v3275_v6 = vld [vmem:[%s5146_s5 + $0x120] ss:$16 sps:$4 sm:$0xff]   ;;  %v3278_v0 = vld [vmem:[%s5146_s5 + $0x88] ss:$16 sps:$4 sm:$0xff]   ;;  %v3282_v37 = vld [vmem:[%s5146_s5 + $0xac] ss:$16 sps:$4 sm:$0xff]  }
 0x146   :  { %2641 = vperm.xlu1 %3233, %v2493_v43   ;;  %1617 = vperm.xlu0 %3232, %v1445_v54   ;;  %v3281_v51 = vld [vmem:[%s5146_s5 + $0x140] ss:$16 sps:$4 sm:$0xff]   ;;  %v3285_v38 = vld [vmem:[%s5146_s5 + $0x164] ss:$16 sps:$4 sm:$0xff]   ;;  %v3284_v22 = vld [vmem:[%s5146_s5 + $0xa8] ss:$16 sps:$4 sm:$0xff]  }
 0x147   :  { %3440 = vtanh.f32 %v1258_v25  ;;  %2255 = vmatprep.subr.bf16.mxu0 %v3553_v4  ;;  %3136 = vmatprep.subr.bf16.mxu1 %v3553_v4  ;;  %v3288_v23 = vld [vmem:[%s5146_s5 + $0xcc] ss:$16 sps:$4 sm:$0xff]   ;;  %v3287_v43 = vld [vmem:[%s5146_s5 + $0x160] ss:$16 sps:$4 sm:$0xff]   ;;  %v3291_v54 = vld [vmem:[%s5146_s5 + $0x184] ss:$16 sps:$4 sm:$0xff]  }
 0x148   :  { %3442 = vtanh.f32 %v1257_v35  ;;  %2115 = vmatmul.mubr.bf16.gmra.mrb[12].mxu1 %v3245_v24  ;;  %v1209_v34 = vpop.permute.xlu1 %1208  ;;  %v1204_v29 = vpop.permute.xlu0 %1203  ;;  %v3290_v46 = vld [vmem:[%s5146_s5 + $0xc8] ss:$16 sps:$4 sm:$0xff]   ;;  %v3294_v48 = vld [vmem:[%s5146_s5 + $0xec] ss:$16 sps:$4 sm:$0xff]   ;;  %v3293_v24 = vld [vmem:[%s5146_s5 + $0x180] ss:$16 sps:$4 sm:$0xff]  }
 0x149   :  { %v3437_v36 = vpop.eup %3436  ;;  %v1260_v16 = vadd.f32 %v1209_v34, %v908_v49  ;;  %v1259_v8 = vadd.f32 %v1204_v29, %v903_v13  ;;  %2122 = vmatprep.mubr.bf16.mxu1 %v3246_v47  ;;  %v3297_v25 = vld [vmem:[%s5146_s5 + $0x1a4] ss:$16 sps:$4 sm:$0xff]   ;;  %v3296_v35 = vld [vmem:[%s5146_s5 + $0xe8] ss:$16 sps:$4 sm:$0xff]   ;;  %v3300_v47 = vld [vmem:[%s5146_s5 + $0x10c] ss:$16 sps:$4 sm:$0xff]  }
 0x14a   :  { %v3439_v9 = vpop.eup %3438  ;;  %2646 = vperm.xlu1 %3233, %v2494_v59   ;;  %1622 = vperm.xlu0 %3232, %v1446_v55   ;;  %v3299_v49 = vld [vmem:[%s5146_s5 + $0x1a0] ss:$16 sps:$4 sm:$0xff]   ;;  %v3303_v13 = vld [vmem:[%s5146_s5 + $0x1c4] ss:$16 sps:$4 sm:$0xff]   ;;  %v3302_v59 = vld [vmem:[%s5146_s5 + $0x108] ss:$16 sps:$4 sm:$0xff]  }
 0x14b   :  { %3444 = vtanh.f32 %v1260_v16  ;;  %v1409_v58 = vpack.c.bf16 %v3437_v36, %v3439_v9  ;;  %v3306_v55 = vld [vmem:[%s5146_s5 + $0x12c] ss:$16 sps:$4 sm:$0xff]   ;;  %v3305_v34 = vld [vmem:[%s5146_s5 + $0x1c0] ss:$16 sps:$4 sm:$0xff]   ;;  %v3309_v29 = vld [vmem:[%s5146_s5 + $0x1e4] ss:$16 sps:$4 sm:$0xff]  }
 0x14c   :  { %3446 = vtanh.f32 %v1259_v8  ;;  %v3308_v36 = vld [vmem:[%s5146_s5 + $0x128] ss:$16 sps:$4 sm:$0xff]   ;;  %v3312_v16 = vld [vmem:[%s5146_s5 + $0x14c] ss:$16 sps:$4 sm:$0xff]   ;;  %v3311_v8 = vld [vmem:[%s5146_s5 + $0x1e0] ss:$16 sps:$4 sm:$0xff]  }
 0x14d   :  { %2256 = vmatpush1.bf16.msra.mxu0 %v1409_v58  ;;  %3145 = vmatpush1.bf16.msra.mxu1 %v1409_v58  ;;  %v3315_v9 = vld [vmem:[%s5146_s5 + $0x204] ss:$16 sps:$4 sm:$0xff]   ;;  %v3314_v58 = vld [vmem:[%s5146_s5 + $0x148] ss:$16 sps:$4 sm:$0xff]  }
 0x14e   :  { %2651 = vperm.xlu1 %3233, %v2495_v56   ;;  %1627 = vperm.xlu0 %3232, %v1447_v52   ;;  %v3318_v56 = vld [vmem:[%s5146_s5 + $0x16c] ss:$16 sps:$4 sm:$0xff]   ;;  %v3317_v52 = vld [vmem:[%s5146_s5 + $0x200] ss:$16 sps:$4 sm:$0xff]  }
 0x14f   :  { %2257 = vmatprep.subr.bf16.mxu0 %v3553_v4  ;;  %3137 = vmatprep.subr.bf16.mxu1 %v3553_v4 }
 0x150   :  { %2123 = vmatmul.mubr.bf16.gmra.mrb[16].mxu1 %v3248_v27  ;;  %v3321_v27 = vld [vmem:[%s5146_s5 + $0x224] ss:$16 sps:$4 sm:$0xff]  }
 0x151   :  { %v3441_v61 = vpop.eup %3440  ;;  %2130 = vmatprep.mubr.bf16.mxu1 %v3249_v3  ;;  %v3320_v3 = vld [vmem:[%s5146_s5 + $0x168] ss:$16 sps:$4 sm:$0xff]  }
 0x152   :  { %v3443_v62 = vpop.eup %3442  ;;  %2656 = vperm.xlu1 %3233, %v2496_v33   ;;  %1632 = vperm.xlu0 %3232, %v1448_v7   ;;  %v3324_v33 = vld [vmem:[%s5146_s5 + $0x18c] ss:$16 sps:$4 sm:$0xff]   ;;  %v3323_v7 = vld [vmem:[%s5146_s5 + $0x220] ss:$16 sps:$4 sm:$0xff]  }
 0x153   :  { %v1410_v53 = vpack.c.bf16 %v3441_v61, %v3443_v62  ;;  %v3327_v61 = vld [vmem:[%s5146_s5 + $0x244] ss:$16 sps:$4 sm:$0x3f]   ;;  %v3326_v62 = vld [vmem:[%s5146_s5 + $0x188] ss:$16 sps:$4 sm:$0xff]  }
 0x155   :  { %v3445_v1 = vpop.eup %3444  ;;  %2258 = vmatpush1.bf16.msra.mxu0 %v1410_v53  ;;  %3146 = vmatpush1.bf16.msra.mxu1 %v1410_v53  ;;  %v3330_v53 = vld [vmem:[%s5146_s5 + $0x1ac] ss:$16 sps:$4 sm:$0xff]  }
 0x156   :  { %v3447_v28 = vpop.eup %3446  ;;  %2661 = vperm.xlu1 %3233, %v2497_v10   ;;  %1637 = vperm.xlu0 %3232, %v1449_v40   ;;  %v3329_v10 = vld [vmem:[%s5146_s5 + $0x240] ss:$16 sps:$4 sm:$0x3f]   ;;  %v3335_v40 = vld [vmem:[%s5146_s5 + $0x20c] ss:$16 sps:$4 sm:$0xff]  }
 0x157   :  { %2259 = vmatprep.subr.bf16.mxu0 %v3553_v4  ;;  %3138 = vmatprep.subr.bf16.mxu1 %v3553_v4  ;;  %v1411_v41 = vpack.c.bf16 %v3445_v1, %v3447_v28  ;;  %v3258_v4 = vld [vmem:[%s5146_s5 + $0x2c] ss:$16 sps:$4 sm:$0xff]   ;;  %v3333_v28 = vld [vmem:[%s5146_s5 + $0x208] ss:$16 sps:$4 sm:$0xff]  }
 0x158   :  { %2131 = vmatmul.mubr.bf16.gmra.mrb[20].mxu1 %v3251_v5  ;;  %v3332_v5 = vld [vmem:[%s5146_s5 + $0x1a8] ss:$16 sps:$4 sm:$0xff]   ;;  %v3336_v1 = vld [vmem:[%s5146_s5 + $0x1cc] ss:$16 sps:$4 sm:$0xff]  }
 0x159   :  { %2260 = vmatpush1.bf16.msra.mxu0 %v1411_v41  ;;  %3147 = vmatpush1.bf16.msra.mxu1 %v1411_v41  ;;  %v3339_v41 = vld [vmem:[%s5146_s5 + $0x22c] ss:$16 sps:$4 sm:$0xff]  }
 0x15a   :  { %2671 = vperm.xlu1 %3233, %v2499_v19   ;;  %2666 = vperm.xlu0 %3232, %v2498_v14   ;;  %v3338_v19 = vld [vmem:[%s5146_s5 + $0x1c8] ss:$16 sps:$4 sm:$0xff]   ;;  %v3342_v14 = vld [vmem:[%s5146_s5 + $0x1ec] ss:$16 sps:$4 sm:$0xff]  }
 0x15b   :  { %2138 = vmatprep.mubr.bf16.mxu1 %v3255_v42  ;;  %v3341_v42 = vld [vmem:[%s5146_s5 + $0x228] ss:$16 sps:$4 sm:$0xff]  }
 0x15c   :  { %2276 = vmatmul.mubr.bf16.vlgmr.msra.gmra.mrb[52].mxu0 %v3252_v63  ;;  %v3345_v63 = vld [vmem:[%s5146_s5 + $0x24c] ss:$16 sps:$4 sm:$0x3f]  }
 0x15d   :  { %2976 = vmatprep.mubr.msk.bf16.mxu0 %vm445_vm0, %v3258_v4  ;;  %v3344_v4 = vld [vmem:[%s5146_s5 + $0x1e8] ss:$16 sps:$4 sm:$0xff]  }
 0x15e   :  { %2681 = vperm.xlu1 %3233, %v2501_v21   ;;  %2676 = vperm.xlu0 %3232, %v2500_v2   ;;  %v3347_v21 = vld [vmem:[%s5146_s5 + $0x248] ss:$16 sps:$4 sm:$0x3f]   ;;  %v1453_v2 = vpop.permute.xlu0 %1452  ;;  %s3554_s5 = smov [#allocation3]  }
 0x15f   :  { %s2840_s8 = sshll.u32 %s3554_s5, 4  ;;  %s2841_s8 = int_to_ptr.vmem [resolvable:$true] %s2840_s8 }
 0x160   :  { %2139 = vmatmul.mubr.bf16.gmra.mrb[24].mxu1 %v3257_v15  ;;  %v1458_v15 = vpop.permute.xlu1 %1457  ;;  %s3529_s17 = scalar_lea.vmem %s2841_s8, 16  ;;  %s3533_s2 = scalar_lea.vmem %s2841_s8, 32 }
 0x161   :  { %2146 = vmatprep.mubr.bf16.mxu1 %v3261_v18  ;;  %p3530_p0 = scmp.ne.s32.totalorder %s2841_s8, %s3529_s17  ;;  %p3534_p1 = scmp.lt.s32.totalorder %s2841_s8, %s2841_s8 }
 0x162   :  { %2691 = vperm.xlu1 %3233, %v2503_v20   ;;  %2686 = vperm.xlu0 %3232, %v2502_v57   ;;  %v4918_v18 = vpop.permute.xlu0 %1462  ;;  %p3535_p2 = scmp.lt.s32.totalorder %s3533_s2, %s3529_s17 }
 0x164   :  { %2284 = vmatmul.mubr.bf16.gmra.mrb[56].mxu0 %v3260_v11  ;;  %v4920_v20 = vpop.permute.xlu1 %1467  ;;  %p3536_p3 = por %p3535_p2, %p3534_p1 }
 0x165   :  { %2977 = vmatprep.mubr.msk.bf16.mxu0 %vm445_vm0, %v3264_v39 }
 0x166   :  { %2818 = vperm.xlu0 %3232, %v2815_v26   ;;  %v4922_v57 = vpop.permute.xlu0 %1472  ;;  %p3537_p4 = pnand %p3536_p3, %p3530_p0 }
 0x168   :  { %2147 = vmatmul.mubr.bf16.gmra.mrb[28].mxu1 %v3263_v31  ;;  %v4924_v11 = vpop.permute.xlu1 %1477 }
 0x169   :  { %2154 = vmatprep.mubr.bf16.mxu1 %v3267_v44 }
 0x16a   :  { %v4926_v39 = vpop.permute.xlu0 %1482 }
 0x16c   :  { %2292 = vmatmul.mubr.bf16.gmra.mrb[60].mxu0 %v3266_v17  ;;  %v4928_v26 = vpop.permute.xlu1 %1487 }
 0x16d   :  { %2978 = vmatprep.mubr.msk.bf16.mxu0 %vm445_vm0, %v3270_v12 }
 0x16e   :  { %v4930_v31 = vpop.permute.xlu0 %1492 }
 0x170   :  { %2155 = vmatmul.mubr.bf16.gmra.mrb[32].mxu1 %v3269_v60  ;;  %v4932_v44 = vpop.permute.xlu1 %1497 }
 0x171   :  { %2162 = vmatprep.mubr.bf16.mxu1 %v3273_v50 }
 0x172   :  { %v4934_v17 = vpop.permute.xlu0 %1502 }
 0x174   :  { %2300 = vmatmul.mubr.bf16.gmra.mrb[64].mxu0 %v3272_v45  ;;  %v4936_v12 = vpop.permute.xlu1 %1507 }
 0x175   :  { %2979 = vmatprep.mubr.msk.bf16.mxu0 %vm445_vm0, %v3276_v32 }
 0x176   :  { %v4938_v60 = vpop.permute.xlu0 %1512 }
 0x178   :  { %2163 = vmatmul.mubr.bf16.gmra.mrb[36].mxu1 %v3275_v6  ;;  %v4940_v50 = vpop.permute.xlu1 %1517 }
 0x179   :  { %2170 = vmatprep.mubr.bf16.mxu1 %v3279_v30 }
 0x17a   :  { %v4942_v30 = vpop.permute.xlu0 %1522 }
 0x17c   :  { %2308 = vmatmul.mubr.bf16.gmra.mrb[68].mxu0 %v3278_v0 }
 0x17d   :  { %2980 = vmatprep.mubr.msk.bf16.mxu0 %vm445_vm0, %v3282_v37  ;;  %v4944_v37 = vpop.permute.xlu1 %1527 }
 0x180   :  { %2171 = vmatmul.mubr.bf16.gmra.mrb[40].mxu1 %v3281_v51 }
 0x181   :  { %2178 = vmatprep.mubr.bf16.mxu1 %v3285_v38  ;;  %v4946_v38 = vpop.permute.xlu0 %1532 }
 0x184   :  { %2316 = vmatmul.mubr.bf16.gmra.mrb[72].mxu0 %v3284_v22 }
 0x185   :  { %2981 = vmatprep.mubr.msk.bf16.mxu0 %vm445_vm0, %v3288_v23 }
 0x188   :  { %2179 = vmatmul.mubr.bf16.gmra.mrb[44].mxu1 %v3287_v43  ;;  %v4948_v43 = vpop.permute.xlu1 %1537 }
 0x189   :  { %2186 = vmatprep.mubr.bf16.mxu1 %v3291_v54 }
 0x18c   :  { %2324 = vmatmul.mubr.bf16.gmra.mrb[76].mxu0 %v3290_v46  ;;  %v4950_v46 = vpop.permute.xlu0 %1542 }
 0x18d   :  { %2982 = vmatprep.mubr.msk.bf16.mxu0 %vm445_vm0, %v3294_v48 }
 0x190   :  { %2187 = vmatmul.mubr.bf16.gmra.mrb[48].mxu1 %v3293_v24  ;;  %v4952_v24 = vpop.permute.xlu1 %1547 }
 0x191   :  { %2194 = vmatprep.mubr.bf16.mxu1 %v3297_v25 }
 0x194   :  { %2332 = vmatmul.mubr.bf16.gmra.mrb[80].mxu0 %v3296_v35 }
 0x195   :  { %2983 = vmatprep.mubr.msk.bf16.mxu0 %vm445_vm0, %v3300_v47 }
 0x198   :  { %2195 = vmatmul.mubr.bf16.gmra.mrb[52].mxu1 %v3299_v49  ;;  %v4956_v49 = vpop.permute.xlu0 %1552 }
 0x199   :  { %2202 = vmatprep.mubr.bf16.mxu1 %v3303_v13  ;;  %v4958_v13 = vpop.permute.xlu1 %1557 }
 0x19c   :  { %2340 = vmatmul.mubr.bf16.gmra.mrb[84].mxu0 %v3302_v59 }
 0x19d   :  { %2984 = vmatprep.mubr.msk.bf16.mxu0 %vm445_vm0, %v3306_v55 }
 0x1a0   :  { %2203 = vmatmul.mubr.bf16.gmra.mrb[56].mxu1 %v3305_v34 }
 0x1a1   :  { %2210 = vmatprep.mubr.bf16.mxu1 %v3309_v29  ;;  %v4964_v29 = vpop.permute.xlu0 %1562 }
 0x1a4   :  { %2348 = vmatmul.mubr.bf16.gmra.mrb[88].mxu0 %v3308_v36 }
 0x1a5   :  { %2985 = vmatprep.mubr.msk.bf16.mxu0 %vm445_vm0, %v3312_v16  ;;  %v4966_v16 = vpop.permute.xlu1 %1567 }
 0x1a8   :  { %2211 = vmatmul.mubr.bf16.gmra.mrb[60].mxu1 %v3311_v8 }
 0x1a9   :  { %2218 = vmatprep.mubr.bf16.mxu1 %v3315_v9  ;;  %v4970_v9 = vpop.permute.xlu0 %1572 }
 0x1ac   :  { %2356 = vmatmul.mubr.bf16.gmra.mrb[92].mxu0 %v3314_v58 }
 0x1ad   :  { %2986 = vmatprep.mubr.msk.bf16.mxu0 %vm445_vm0, %v3318_v56 }
 0x1b0   :  { %2219 = vmatmul.mubr.bf16.gmra.mrb[64].mxu1 %v3317_v52  ;;  %v4974_v52 = vpop.permute.xlu1 %1577 }
 0x1b1   :  { %2226 = vmatprep.mubr.bf16.mxu1 %v3321_v27 }
 0x1b4   :  { %2364 = vmatmul.mubr.bf16.gmra.mrb[96].mxu0 %v3320_v3  ;;  %v4976_v3 = vpop.permute.xlu0 %1582 }
 0x1b5   :  { %2987 = vmatprep.mubr.msk.bf16.mxu0 %vm445_vm0, %v3324_v33 }
 0x1b8   :  { %2227 = vmatmul.mubr.bf16.gmra.mrb[68].mxu1 %v3323_v7  ;;  %v4980_v7 = vpop.permute.xlu1 %1587 }
 0x1b9   :  { %2234 = vmatprep.mubr.bf16.mxu1 %v3327_v61 }
 0x1bc   :  { %2372 = vmatmul.mubr.bf16.gmra.mrb[100].mxu0 %v3326_v62 }
 0x1bd   :  { %2988 = vmatprep.mubr.msk.bf16.mxu0 %vm445_vm0, %v3330_v53 }
 0x1c0   :  { %2235 = vmatmul.mubr.bf16.gmra.mrb[72].mxu1 %v3329_v10 }
 0x1c1   :  { %2991 = vmatprep.mubr.msk.bf16.mxu1 %vm445_vm0, %v3335_v40 }
 0x1c4   :  { %2380 = vmatmul.mubr.bf16.gmra.mrb[104].mxu0 %v3332_v5  ;;  %v4984_v5 = vpop.permute.xlu0 %1592 }
 0x1c5   :  { %2989 = vmatprep.mubr.msk.bf16.mxu0 %vm445_vm0, %v3336_v1 }
 0x1c8   :  { %2404 = vmatmul.mubr.bf16.vlgmr.msra.gmra.mrb[64].mxu1 %v3333_v28 }
 0x1c9   :  { %2992 = vmatprep.mubr.msk.bf16.mxu1 %vm445_vm0, %v3339_v41 }
 0x1cc   :  { %2388 = vmatmul.mubr.bf16.gmra.mrb[108].mxu0 %v3338_v19 }
 0x1cd   :  { %2990 = vmatprep.mubr.msk.bf16.mxu0 %vm445_vm0, %v3342_v14  ;;  %v4986_v14 = vpop.permute.xlu1 %1597 }
 0x1d0   :  { %2412 = vmatmul.mubr.bf16.gmra.mrb[68].mxu1 %v3341_v42 }
 0x1d1   :  { %2993 = vmatprep.mubr.msk.bf16.mxu1 %vm445_vm0, %v3345_v63 }
 0x1d4   :  { %2396 = vmatmul.mubr.bf16.gmra.mrb[112].mxu0 %v3344_v4 }
 0x1d8   :  { %2420 = vmatmul.mubr.bf16.gmra.mrb[72].mxu1 %v3347_v21 }
 0x203   :  { %v2092_v45 = vpop.f32.mrb[0].mxu1 }
 0x204   :  { %v2094_v32 = vpop.f32.mrb[1].mxu1  ;;  %v2093_v53 = vadd.f32 %v2092_v45, %v1453_v2  ;;  %v4992_v2 = vpop.permute.xlu0 %1602 }
 0x205   :  { %v2095_v6 = vpop.f32.mrb[2].mxu1 }
 0x206   :  { %v2097_v0 = vpop.f32.mrb[3].mxu1  ;;  %v2096_v1 = vadd.f32 %v2095_v6, %v1458_v15  ;;  %v4995_v6 = vpop.permute.xlu1 %1607 }
 0x20b   :  { %v2100_v51 = vpop.f32.mrb[4].mxu1 }
 0x20c   :  { %v2102_v22 = vpop.f32.mrb[5].mxu1  ;;  %v2101_v45 = vadd.f32 %v2100_v51, %v4918_v18 }
 0x20d   :  { %v2103_v23 = vpop.f32.mrb[6].mxu1 }
 0x20e   :  { %v2105_v54 = vpop.f32.mrb[7].mxu1  ;;  %v2104_v22 = vadd.f32 %v2103_v23, %v4920_v20 }
 0x213   :  { %v2108_v48 = vpop.f32.mrb[8].mxu1 }
 0x214   :  { %v2110_v25 = vpop.f32.mrb[9].mxu1 }
 0x215   :  { %v4954_v35 = vpop.f32.mrb[10].mxu1 }
 0x216   :  { %v2113_v47 = vpop.f32.mrb[11].mxu1 }
 0x21b   :  { %v4960_v59 = vpop.f32.mrb[12].mxu1 }
 0x21c   :  { %v2118_v55 = vpop.f32.mrb[13].mxu1 }
 0x21d   :  { %v4962_v34 = vpop.f32.mrb[14].mxu1 }
 0x21e   :  { %v2121_v36 = vpop.f32.mrb[15].mxu1 }
 0x223   :  { %v4968_v8 = vpop.f32.mrb[16].mxu1 }
 0x224   :  { %v2126_v58 = vpop.f32.mrb[17].mxu1 }
 0x225   :  { %v4972_v56 = vpop.f32.mrb[18].mxu1 }
 0x226   :  { %v2129_v27 = vpop.f32.mrb[19].mxu1 }
 0x22b   :  { %v4978_v33 = vpop.f32.mrb[20].mxu1 }
 0x22c   :  { %v2134_v61 = vpop.f32.mrb[21].mxu1 }
 0x22d   :  { %v4982_v62 = vpop.f32.mrb[22].mxu1  ;;  %v2507_v61 = vpop.permute.xlu0 %2506 }
 0x22e   :  { %v2137_v10 = vpop.f32.mrb[23].mxu1 }
 0x22f   :  { %v2277_v40 = vpop.f32.mrb[52].mxu0 }
 0x230   :  { %v2278_v28 = vadd.f32 %v2277_v40, %v2093_v53  ;;  %v2279_v41 = vpop.f32.mrb[53].mxu0  ;;  %v2512_v40 = vpop.permute.xlu1 %2511 }
 0x231   :  { %v2280_v19 = vpop.f32.mrb[54].mxu0  ;;  %v2112_v41 = vadd.f32 %v4954_v35, %v4924_v11 }
 0x232   :  { %3448 = vtanh.f32 %v2278_v28  ;;  %v2281_v42 = vadd.f32 %v2280_v19, %v2096_v1  ;;  %v2282_v63 = vpop.f32.mrb[55].mxu0  ;;  %v2109_v1 = vadd.f32 %v2108_v48, %v4922_v57  ;;  %v2517_v48 = vpop.permute.xlu0 %2516 }
 0x233   :  { %v4988_v4 = vpop.f32.mrb[24].mxu1 }
 0x234   :  { %3450 = vtanh.f32 %v2281_v42  ;;  %v2142_v21 = vpop.f32.mrb[25].mxu1  ;;  %v2522_v35 = vpop.permute.xlu1 %2521 }
 0x235   :  { %v4990_v32 = vpop.f32.mrb[26].mxu1 }
 0x236   :  { %v2145_v0 = vpop.f32.mrb[27].mxu1 }
 0x237   :  { %v2285_v15 = vpop.f32.mrb[56].mxu0 }
 0x238   :  { %v2286_v54 = vadd.f32 %v2285_v15, %v2101_v45  ;;  %v2287_v25 = vpop.f32.mrb[57].mxu0 }
 0x239   :  { %v2288_v47 = vpop.f32.mrb[58].mxu0 }
 0x23a   :  { %3452 = vtanh.f32 %v2286_v54  ;;  %v2289_v55 = vadd.f32 %v2288_v47, %v2104_v22  ;;  %v2290_v36 = vpop.f32.mrb[59].mxu0 }
 0x23b   :  { %v4998_v58 = vpop.f32.mrb[28].mxu1  ;;  %v2117_v36 = vadd.f32 %v4960_v59, %v4926_v39  ;;  %v2527_v59 = vpop.permute.xlu0 %2526 }
 0x23c   :  { %v3449_v27 = vpop.eup %3448  ;;  %3454 = vtanh.f32 %v2289_v55  ;;  %v2150_v53 = vpop.f32.mrb[29].mxu1 }
 0x23d   :  { %v2694_v10 = vmul.f32 %v3449_v27, %v2507_v61  ;;  %v5000_v18 = vpop.f32.mrb[30].mxu1 }
 0x23e   :  { %v3451_v51 = vpop.eup %3450  ;;  %v2153_v20 = vpop.f32.mrb[31].mxu1 }
 0x23f   :  { %v2695_v23 = vmul.f32 %v3451_v51, %v2512_v40  ;;  %v2293_v28 = vpop.f32.mrb[60].mxu0  ;;  %v2733_v63 = vsel %vm2732_vm1, %v2694_v10, 0.0  ;;  %v2120_v51 = vadd.f32 %v4962_v34, %v4928_v26  ;;  %v2532_v34 = vpop.permute.xlu1 %2531 }
 0x240   :  { %v2294_v19 = vadd.f32 %v2293_v28, %v2109_v1  ;;  %v2295_v42 = vpop.f32.mrb[61].mxu0 }
 0x241   :  { %v2734_v21 = vsel %vm2732_vm1, %v2695_v23, 0.0  ;;  %v2296_v45 = vpop.f32.mrb[62].mxu0 }
 0x242   :  { %v2735_v0 = vadd.f32 %v2734_v21, %v2733_v63  ;;  %3456 = vtanh.f32 %v2294_v19  ;;  %v2297_v15 = vadd.f32 %v2296_v45, %v2112_v41  ;;  %v2298_v22 = vpop.f32.mrb[63].mxu0 }
 0x243   :  { %v5007_v54 = vpop.f32.mrb[32].mxu1 }
 0x244   :  { %v3453_v57 = vpop.eup %3452  ;;  %3458 = vtanh.f32 %v2297_v15  ;;  %v2158_v25 = vpop.f32.mrb[33].mxu1 }
 0x245   :  { %v2696_v47 = vmul.f32 %v3453_v57, %v2517_v48  ;;  %v5009_v55 = vpop.f32.mrb[34].mxu1 }
 0x246   :  { %v3455_v11 = vpop.eup %3454  ;;  %v2161_v27 = vpop.f32.mrb[35].mxu1 }
 0x247   :  { %v2736_v61 = vsel %vm2732_vm1, %v2696_v47, 0.0  ;;  %v2697_v53 = vmul.f32 %v3455_v11, %v2522_v35  ;;  %v2301_v10 = vpop.f32.mrb[64].mxu0  ;;  %v2128_v47 = vadd.f32 %v4972_v56, %v4932_v44  ;;  %v2133_v56 = vadd.f32 %v4978_v33, %v4934_v17 }
 0x248   :  { %v2737_v40 = vadd.f32 %v2736_v61, %v2735_v0  ;;  %v2302_v1 = vadd.f32 %v2301_v10, %v2117_v36  ;;  %v2303_v20 = vpop.f32.mrb[65].mxu0  ;;  %v2125_v0 = vadd.f32 %v4968_v8, %v4930_v31 }
 0x249   :  { %v2738_v23 = vsel %vm2732_vm1, %v2697_v53, 0.0  ;;  %v2304_v28 = vpop.f32.mrb[66].mxu0  ;;  %v2537_v53 = vpop.permute.xlu0 %2536 }
 0x24a   :  { %v2739_v41 = vadd.f32 %v2738_v23, %v2737_v40  ;;  %3460 = vtanh.f32 %v2302_v1  ;;  %v2305_v19 = vadd.f32 %v2304_v28, %v2120_v51  ;;  %v2306_v42 = vpop.f32.mrb[67].mxu0  ;;  %v2542_v1 = vpop.permute.xlu1 %2541 }
 0x24b   :  { %v5017_v63 = vpop.f32.mrb[36].mxu1 }
 0x24c   :  { %v3457_v39 = vpop.eup %3456  ;;  %3462 = vtanh.f32 %v2305_v19  ;;  %v2166_v21 = vpop.f32.mrb[37].mxu1 }
 0x24d   :  { %v2698_v45 = vmul.f32 %v3457_v39, %v2527_v59  ;;  %v5019_v15 = vpop.f32.mrb[38].mxu1  ;;  %v2547_v59 = vpop.permute.xlu0 %2546  ;;  %v2136_v21 = vadd.f32 %v4982_v62, %v4936_v12 }
 0x24e   :  { %v3459_v26 = vpop.eup %3458  ;;  %v2169_v22 = vpop.f32.mrb[39].mxu1 }
 0x24f   :  { %v2740_v57 = vsel %vm2732_vm1, %v2698_v45, 0.0  ;;  %v2699_v48 = vmul.f32 %v3459_v26, %v2532_v34  ;;  %v2309_v25 = vpop.f32.mrb[68].mxu0 }
 0x250   :  { %v2741_v11 = vadd.f32 %v2740_v57, %v2739_v41  ;;  %v2310_v35 = vadd.f32 %v2309_v25, %v2125_v0  ;;  %v2311_v36 = vpop.f32.mrb[69].mxu0  ;;  %v2552_v57 = vpop.permute.xlu1 %2551 }
 0x251   :  { %v2742_v27 = vsel %vm2732_vm1, %v2699_v48, 0.0  ;;  %v2312_v61 = vpop.f32.mrb[70].mxu0  ;;  %v2557_v62 = vpop.permute.xlu0 %2556 }
 0x252   :  { %v2743_v10 = vadd.f32 %v2742_v27, %v2741_v11  ;;  %3464 = vtanh.f32 %v2310_v35  ;;  %v2313_v51 = vadd.f32 %v2312_v61, %v2128_v47  ;;  %v2314_v40 = vpop.f32.mrb[71].mxu0  ;;  %v2141_v27 = vadd.f32 %v4988_v4, %v4938_v60 }
 0x253   :  { %v5027_v31 = vpop.f32.mrb[40].mxu1 }
 0x254   :  { %v3461_v8 = vpop.eup %3460  ;;  %3466 = vtanh.f32 %v2313_v51  ;;  %v2174_v20 = vpop.f32.mrb[41].mxu1 }
 0x255   :  { %v2700_v23 = vmul.f32 %v3461_v8, %v2537_v53  ;;  %v5029_v28 = vpop.f32.mrb[42].mxu1  ;;  %v2562_v40 = vpop.permute.xlu1 %2561  ;;  %v2144_v8 = vadd.f32 %v4990_v32, %v4940_v50 }
 0x256   :  { %v3463_v44 = vpop.eup %3462  ;;  %v2177_v41 = vpop.f32.mrb[43].mxu1 }
 0x257   :  { %v2744_v19 = vsel %vm2732_vm1, %v2700_v23, 0.0  ;;  %v2701_v42 = vmul.f32 %v3463_v44, %v2542_v1  ;;  %v2317_v39 = vpop.f32.mrb[72].mxu0 }
 0x258   :  { %v2745_v45 = vadd.f32 %v2744_v19, %v2743_v10  ;;  %v2318_v26 = vadd.f32 %v2317_v39, %v2133_v56  ;;  %v2319_v34 = vpop.f32.mrb[73].mxu0  ;;  %v2567_v39 = vpop.permute.xlu0 %2566 }
 0x259   :  { %v2746_v0 = vsel %vm2732_vm1, %v2701_v42, 0.0  ;;  %v2320_v22 = vpop.f32.mrb[74].mxu0  ;;  %v2572_v32 = vpop.permute.xlu1 %2571 }
 0x25a   :  { %v2747_v48 = vadd.f32 %v2746_v0, %v2745_v45  ;;  %3468 = vtanh.f32 %v2318_v26  ;;  %v2321_v25 = vadd.f32 %v2320_v22, %v2136_v21  ;;  %v2322_v17 = vpop.f32.mrb[75].mxu0  ;;  %v2149_v26 = vadd.f32 %v4998_v58, %v4942_v30 }
 0x25b   :  { %v5037_v33 = vpop.f32.mrb[44].mxu1 }
 0x25c   :  { %v3465_v47 = vpop.eup %3464  ;;  %3470 = vtanh.f32 %v2321_v25  ;;  %v2182_v11 = vpop.f32.mrb[45].mxu1 }
 0x25d   :  { %v2702_v35 = vmul.f32 %v3465_v47, %v2547_v59  ;;  %v5039_v36 = vpop.f32.mrb[46].mxu1 }
 0x25e   :  { %v3467_v12 = vpop.eup %3466  ;;  %v2185_v61 = vpop.f32.mrb[47].mxu1 }
 0x25f   :  { %v2748_v53 = vsel %vm2732_vm1, %v2702_v35, 0.0  ;;  %v2703_v10 = vmul.f32 %v3467_v12, %v2552_v57  ;;  %v2325_v51 = vpop.f32.mrb[76].mxu0  ;;  %v2577_v12 = vpop.permute.xlu0 %2576 }
 0x260   :  { %v2749_v1 = vadd.f32 %v2748_v53, %v2747_v48  ;;  %v2326_v20 = vadd.f32 %v2325_v51, %v2141_v27  ;;  %v2327_v23 = vpop.f32.mrb[77].mxu0  ;;  %v2152_v48 = vadd.f32 %v5000_v18, %v4944_v37  ;;  %v2582_v53 = vpop.permute.xlu1 %2581  ;;  %v2157_v18 = vadd.f32 %v5007_v54, %v4946_v38 }
 0x261   :  { %v2750_v44 = vsel %vm2732_vm1, %v2703_v10, 0.0  ;;  %v2328_v56 = vpop.f32.mrb[78].mxu0 }
 0x262   :  { %v2751_v41 = vadd.f32 %v2750_v44, %v2749_v1  ;;  %3472 = vtanh.f32 %v2326_v20  ;;  %v2329_v19 = vadd.f32 %v2328_v56, %v2144_v8  ;;  %v2330_v42 = vpop.f32.mrb[79].mxu0  ;;  %v2160_v56 = vadd.f32 %v5009_v55, %v4948_v43 }
 0x263   :  { %v5047_v60 = vpop.f32.mrb[48].mxu1  ;;  %v2587_v44 = vpop.permute.xlu0 %2586 }
 0x264   :  { %v3469_v4 = vpop.eup %3468  ;;  %3474 = vtanh.f32 %v2329_v19  ;;  %v2190_v59 = vpop.f32.mrb[49].mxu1 }
 0x265   :  { %v2704_v21 = vmul.f32 %v3469_v4, %v2557_v62  ;;  %v5049_v45 = vpop.f32.mrb[50].mxu1  ;;  %v2592_v59 = vpop.permute.xlu1 %2591 }
 0x266   :  { %v3471_v50 = vpop.eup %3470  ;;  %v2193_v34 = vpop.f32.mrb[51].mxu1 }
 0x267   :  { %v2752_v0 = vsel %vm2732_vm1, %v2704_v21, 0.0  ;;  %v2705_v22 = vmul.f32 %v3471_v50, %v2562_v40  ;;  %v2333_v57 = vpop.f32.mrb[80].mxu0  ;;  %v2597_v55 = vpop.permute.xlu0 %2596 }
 0x268   :  { %v2753_v25 = vadd.f32 %v2752_v0, %v2751_v41  ;;  %v2334_v17 = vadd.f32 %v2333_v57, %v2149_v26  ;;  %v2335_v47 = vpop.f32.mrb[81].mxu0 }
 0x269   :  { %v2754_v11 = vsel %vm2732_vm1, %v2705_v22, 0.0  ;;  %v2336_v35 = vpop.f32.mrb[82].mxu0  ;;  %v2165_v22 = vadd.f32 %v5017_v63, %v4950_v46  ;;  %v2602_v47 = vpop.permute.xlu1 %2601 }
 0x26a   :  { %v2755_v62 = vadd.f32 %v2754_v11, %v2753_v25  ;;  %3476 = vtanh.f32 %v2334_v17  ;;  %v2337_v27 = vadd.f32 %v2336_v35, %v2152_v48  ;;  %v2338_v61 = vpop.f32.mrb[83].mxu0  ;;  %v2168_v11 = vadd.f32 %v5019_v15, %v4952_v24 }
 0x26b   :  { %v5057_v30 = vpop.f32.mrb[52].mxu1 }
 0x26c   :  { %v3473_v58 = vpop.eup %3472  ;;  %3478 = vtanh.f32 %v2337_v27  ;;  %v2198_v10 = vpop.f32.mrb[53].mxu1 }
 0x26d   :  { %v2706_v51 = vmul.f32 %v3473_v58, %v2567_v39  ;;  %v5059_v40 = vpop.f32.mrb[54].mxu1  ;;  %v2612_v15 = vpop.permute.xlu1 %2611 }
 0x26e   :  { %v3475_v37 = vpop.eup %3474  ;;  %v2201_v8 = vpop.f32.mrb[55].mxu1 }
 0x26f   :  { %v2756_v1 = vsel %vm2732_vm1, %v2706_v51, 0.0  ;;  %v2707_v20 = vmul.f32 %v3475_v37, %v2572_v32  ;;  %v2341_v23 = vpop.f32.mrb[84].mxu0  ;;  %v2607_v37 = vpop.permute.xlu0 %2606 }
 0x270   :  { %v2757_v41 = vadd.f32 %v2756_v1, %v2755_v62  ;;  %v2342_v19 = vadd.f32 %v2341_v23, %v2157_v18  ;;  %v2343_v42 = vpop.f32.mrb[85].mxu0  ;;  %v2173_v1 = vadd.f32 %v5027_v31, %v4956_v49 }
 0x271   :  { %v2758_v4 = vsel %vm2732_vm1, %v2707_v20, 0.0  ;;  %v2344_v39 = vpop.f32.mrb[86].mxu0  ;;  %v2622_v31 = vpop.permute.xlu1 %2621 }
 0x272   :  { %v2759_v21 = vadd.f32 %v2758_v4, %v2757_v41  ;;  %3480 = vtanh.f32 %v2342_v19  ;;  %v2345_v50 = vadd.f32 %v2344_v39, %v2160_v56  ;;  %v2346_v38 = vpop.f32.mrb[87].mxu0  ;;  %v2176_v19 = vadd.f32 %v5029_v28, %v4958_v13 }
 0x273   :  { %v5067_v54 = vpop.f32.mrb[56].mxu1 }
 0x274   :  { %v3477_v26 = vpop.eup %3476  ;;  %3482 = vtanh.f32 %v2345_v50  ;;  %v2206_v32 = vpop.f32.mrb[57].mxu1 }
 0x275   :  { %v2708_v34 = vmul.f32 %v3477_v26, %v2577_v12  ;;  %v5069_v0 = vpop.f32.mrb[58].mxu1  ;;  %v2617_v50 = vpop.permute.xlu0 %2616 }
 0x276   :  { %v3479_v43 = vpop.eup %3478  ;;  %v2209_v57 = vpop.f32.mrb[59].mxu1 }
 0x277   :  { %v2760_v48 = vsel %vm2732_vm1, %v2708_v34, 0.0  ;;  %v2709_v25 = vmul.f32 %v3479_v43, %v2582_v53  ;;  %v2349_v17 = vpop.f32.mrb[88].mxu0  ;;  %v2181_v43 = vadd.f32 %v5037_v33, %v4964_v29 }
 0x278   :  { %v2761_v35 = vadd.f32 %v2760_v48, %v2759_v21  ;;  %v2350_v62 = vadd.f32 %v2349_v17, %v2165_v22  ;;  %v2351_v27 = vpop.f32.mrb[89].mxu0  ;;  %v2184_v48 = vadd.f32 %v5039_v36, %v4966_v16  ;;  %v2189_v16 = vadd.f32 %v5047_v60, %v4970_v9 }
 0x279   :  { %v2762_v12 = vsel %vm2732_vm1, %v2709_v25, 0.0  ;;  %v2352_v61 = vpop.f32.mrb[90].mxu0  ;;  %v2627_v57 = vpop.permute.xlu0 %2626 }
 0x27a   :  { %v2763_v58 = vadd.f32 %v2762_v12, %v2761_v35  ;;  %3484 = vtanh.f32 %v2350_v62  ;;  %v2353_v10 = vadd.f32 %v2352_v61, %v2168_v11  ;;  %v2354_v51 = vpop.f32.mrb[91].mxu0  ;;  %v2632_v27 = vpop.permute.xlu1 %2631 }
 0x27b   :  { %v5077_v46 = vpop.f32.mrb[60].mxu1 }
 0x27c   :  { %v3481_v63 = vpop.eup %3480  ;;  %3486 = vtanh.f32 %v2353_v10  ;;  %v2214_v53 = vpop.f32.mrb[61].mxu1 }
 0x27d   :  { %v2710_v18 = vmul.f32 %v3481_v63, %v2587_v44  ;;  %v5079_v8 = vpop.f32.mrb[62].mxu1  ;;  %v2192_v53 = vadd.f32 %v5049_v45, %v4974_v52 }
 0x27e   :  { %v3483_v24 = vpop.eup %3482  ;;  %v2217_v20 = vpop.f32.mrb[63].mxu1 }
 0x27f   :  { %v2764_v23 = vsel %vm2732_vm1, %v2710_v18, 0.0  ;;  %v2711_v56 = vmul.f32 %v3483_v24, %v2592_v59  ;;  %v2357_v41 = vpop.f32.mrb[92].mxu0  ;;  %v2637_v63 = vpop.permute.xlu1 %2636 }
 0x280   :  { %v2765_v42 = vadd.f32 %v2764_v23, %v2763_v58  ;;  %v2358_v4 = vadd.f32 %v2357_v41, %v2173_v1  ;;  %v2359_v39 = vpop.f32.mrb[93].mxu0  ;;  %v5093_v58 = vpop.permute.xlu0 %1612 }
 0x281   :  { %v2766_v44 = vsel %vm2732_vm1, %v2711_v56, 0.0  ;;  %v2360_v21 = vpop.f32.mrb[94].mxu0 }
 0x282   :  { %v2767_v38 = vadd.f32 %v2766_v44, %v2765_v42  ;;  %3488 = vtanh.f32 %v2358_v4  ;;  %v2361_v26 = vadd.f32 %v2360_v21, %v2176_v19  ;;  %v2362_v32 = vpop.f32.mrb[95].mxu0  ;;  %v2197_v4 = vadd.f32 %v5057_v30, %v4976_v3 }
 0x283   :  { %v2642_v42 = vpop.permute.xlu1 %2641  ;;  %v2200_v44 = vadd.f32 %v5059_v40, %v4980_v7  ;;  %v2205_v7 = vadd.f32 %v5067_v54, %v4984_v5 }
 0x284   :  { %v3485_v49 = vpop.eup %3484  ;;  %3490 = vtanh.f32 %v2361_v26  ;;  %v1618_v9 = vpop.permute.xlu0 %1617 }
 0x285   :  { %v2712_v34 = vmul.f32 %v3485_v49, %v2597_v55 }
 0x286   :  { %v3487_v59 = vpop.eup %3486 }
 0x287   :  { %v2768_v13 = vsel %vm2732_vm1, %v2712_v34, 0.0  ;;  %v2713_v28 = vmul.f32 %v3487_v59, %v2602_v47  ;;  %v2365_v22 = vpop.f32.mrb[96].mxu0  ;;  %v2647_v30 = vpop.permute.xlu1 %2646 }
 0x288   :  { %v2769_v25 = vadd.f32 %v2768_v13, %v2767_v38  ;;  %v2366_v17 = vadd.f32 %v2365_v22, %v2181_v43  ;;  %v2367_v11 = vpop.f32.mrb[97].mxu0  ;;  %v1623_v34 = vpop.permute.xlu0 %1622 }
 0x289   :  { %v2770_v35 = vsel %vm2732_vm1, %v2713_v28, 0.0  ;;  %v2368_v62 = vpop.f32.mrb[98].mxu0 }
 0x28a   :  { %v2771_v55 = vadd.f32 %v2770_v35, %v2769_v25  ;;  %3492 = vtanh.f32 %v2366_v17  ;;  %v2369_v12 = vadd.f32 %v2368_v62, %v2184_v48  ;;  %v2370_v61 = vpop.f32.mrb[99].mxu0  ;;  %v2208_v62 = vadd.f32 %v5069_v0, %v4986_v14 }
 0x28c   :  { %v3489_v29 = vpop.eup %3488  ;;  %3494 = vtanh.f32 %v2369_v12  ;;  %v1628_v35 = vpop.permute.xlu0 %1627 }
 0x28d   :  { %v2714_v33 = vmul.f32 %v3489_v29, %v2607_v37 }
 0x28e   :  { %v3491_v47 = vpop.eup %3490 }
 0x28f   :  { %v2772_v36 = vsel %vm2732_vm1, %v2714_v33, 0.0  ;;  %v2715_v10 = vmul.f32 %v3491_v47, %v2612_v15  ;;  %v2373_v51 = vpop.f32.mrb[100].mxu0  ;;  %v2652_v33 = vpop.permute.xlu1 %2651 }
 0x290   :  { %v2773_v18 = vadd.f32 %v2772_v36, %v2771_v55  ;;  %v2374_v24 = vadd.f32 %v2373_v51, %v2189_v16  ;;  %v2375_v1 = vpop.f32.mrb[101].mxu0  ;;  %v1633_v0 = vpop.permute.xlu0 %1632 }
 0x291   :  { %v2774_v20 = vsel %vm2732_vm1, %v2715_v10, 0.0  ;;  %v2376_v37 = vpop.f32.mrb[102].mxu0 }
 0x292   :  { %v2775_v23 = vadd.f32 %v2774_v20, %v2773_v18  ;;  %3496 = vtanh.f32 %v2374_v24  ;;  %v2377_v56 = vadd.f32 %v2376_v37, %v2192_v53  ;;  %v2378_v41 = vpop.f32.mrb[103].mxu0  ;;  %v2213_v18 = vadd.f32 %v5077_v46, %v4992_v2 }
 0x293   :  { %v2216_v41 = vadd.f32 %v5079_v8, %v4995_v6 }
 0x294   :  { %v3493_v19 = vpop.eup %3492  ;;  %3498 = vtanh.f32 %v2377_v56  ;;  %v2657_v56 = vpop.permute.xlu1 %2656 }
 0x295   :  { %v2716_v60 = vmul.f32 %v3493_v19, %v2617_v50 }
 0x296   :  { %v3495_v15 = vpop.eup %3494 }
 0x297   :  { %v2776_v52 = vsel %vm2732_vm1, %v2716_v60, 0.0  ;;  %v2717_v45 = vmul.f32 %v3495_v15, %v2622_v31  ;;  %v2381_v39 = vpop.f32.mrb[104].mxu0 }
 0x298   :  { %v2777_v21 = vadd.f32 %v2776_v52, %v2775_v23  ;;  %v2382_v38 = vadd.f32 %v2381_v39, %v2197_v4  ;;  %v2383_v26 = vpop.f32.mrb[105].mxu0 }
 0x299   :  { %v2778_v32 = vsel %vm2732_vm1, %v2717_v45, 0.0  ;;  %v2384_v49 = vpop.f32.mrb[106].mxu0  ;;  %v1638_v45 = vpop.permute.xlu0 %1637 }
 0x29a   :  { %v2779_v50 = vadd.f32 %v2778_v32, %v2777_v21  ;;  %3500 = vtanh.f32 %v2382_v38  ;;  %v2385_v59 = vadd.f32 %v2384_v49, %v2200_v44  ;;  %v2386_v43 = vpop.f32.mrb[107].mxu0  ;;  %v2662_v38 = vpop.permute.xlu1 %2661 }
 0x29b   :  { %v2405_v13 = vpop.f32.mrb[64].mxu1 }
 0x29c   :  { %v3497_v3 = vpop.eup %3496  ;;  %3502 = vtanh.f32 %v2385_v59  ;;  %v2407_v31 = vpop.f32.mrb[65].mxu1  ;;  %v3212_v51 = vadd.f32 %v2405_v13, %v5093_v58 }
 0x29d   :  { %v2718_v28 = vmul.f32 %v3497_v3, %v2627_v57  ;;  %v2408_v22 = vpop.f32.mrb[66].mxu1  ;;  %v2667_v13 = vpop.permute.xlu0 %2666 }
 0x29e   :  { %v3499_v48 = vpop.eup %3498  ;;  %v2410_v40 = vpop.f32.mrb[67].mxu1  ;;  %v3213_v37 = vadd.f32 %v2408_v22, %v1618_v9 }
 0x29f   :  { %v2780_v25 = vsel %vm2732_vm1, %v2718_v28, 0.0  ;;  %v2719_v17 = vmul.f32 %v3499_v48, %v2632_v27  ;;  %v2389_v11 = vpop.f32.mrb[108].mxu0 }
 0x2a0   :  { %v2781_v55 = vadd.f32 %v2780_v25, %v2779_v50  ;;  %v2390_v12 = vadd.f32 %v2389_v11, %v2205_v7  ;;  %v2391_v61 = vpop.f32.mrb[109].mxu0 }
 0x2a1   :  { %v2782_v29 = vsel %vm2732_vm1, %v2719_v17, 0.0  ;;  %v2392_v57 = vpop.f32.mrb[110].mxu0 }
 0x2a2   :  { %v2783_v47 = vadd.f32 %v2782_v29, %v2781_v55  ;;  %3504 = vtanh.f32 %v2390_v12  ;;  %v2393_v16 = vadd.f32 %v2392_v57, %v2208_v62  ;;  %v2394_v5 = vpop.f32.mrb[111].mxu0 }
 0x2a3   :  { %v2413_v54 = vpop.f32.mrb[68].mxu1 }
 0x2a4   :  { %v3501_v36 = vpop.eup %3500  ;;  %3506 = vtanh.f32 %v2393_v16  ;;  %v2415_v27 = vpop.f32.mrb[69].mxu1  ;;  %v3214_v52 = vadd.f32 %v2413_v54, %v1623_v34 }
 0x2a5   :  { %v2720_v10 = vmul.f32 %v3501_v36, %v2637_v63  ;;  %v2416_v53 = vpop.f32.mrb[70].mxu1  ;;  %3508 = vtanh.f32 %v3212_v51 }
 0x2a6   :  { %v3503_v14 = vpop.eup %3502  ;;  %v2418_v24 = vpop.f32.mrb[71].mxu1  ;;  %v3215_v39 = vadd.f32 %v2416_v53, %v1628_v35 }
 0x2a7   :  { %v2784_v1 = vsel %vm2732_vm1, %v2720_v10, 0.0  ;;  %v2721_v20 = vmul.f32 %v3503_v14, %v2642_v42  ;;  %v2397_v23 = vpop.f32.mrb[112].mxu0  ;;  %v2677_v35 = vpop.permute.xlu0 %2676 }
 0x2a8   :  { %v2785_v19 = vadd.f32 %v2784_v1, %v2783_v47  ;;  %v2398_v63 = vadd.f32 %v2397_v23, %v2213_v18  ;;  %v2399_v60 = vpop.f32.mrb[113].mxu0 }
 0x2a9   :  { %v2786_v58 = vsel %vm2732_vm1, %v2721_v20, 0.0  ;;  %v2400_v15 = vpop.f32.mrb[114].mxu0 }
 0x2aa   :  { %v2787_v4 = vadd.f32 %v2786_v58, %v2785_v19  ;;  %3510 = vtanh.f32 %v2398_v63  ;;  %v2401_v2 = vadd.f32 %v2400_v15, %v2216_v41  ;;  %v2402_v46 = vpop.f32.mrb[115].mxu0  ;;  %v2821_v41 = vlaneseq }
 0x2ab   :  { %3512 = vtanh.f32 %v3213_v37  ;;  %v2421_v42 = vpop.f32.mrb[72].mxu1  ;;  %v2687_v10 = vpop.permute.xlu0 %2686 }
 0x2ac   :  { %v3505_v9 = vpop.eup %3504  ;;  %3514 = vtanh.f32 %v2401_v2  ;;  %v2423_v44 = vpop.f32.mrb[73].mxu1  ;;  %v3216_v26 = vadd.f32 %v2421_v42, %v1633_v0  ;;  %v2822_v60 = vshrl.u32 %v2821_v41, 7 }
 0x2ad   :  { %v2722_v6 = vmul.f32 %v3505_v9, %v2647_v30  ;;  %v2424_v8 = vpop.f32.mrb[74].mxu1  ;;  %3516 = vtanh.f32 %v3214_v52  ;;  %v2672_v30 = vpop.permute.xlu1 %2671 }
 0x2ae   :  { %v3507_v21 = vpop.eup %3506  ;;  %v2426_v32 = vpop.f32.mrb[75].mxu1  ;;  %3518 = vtanh.f32 %v3215_v39  ;;  %v3217_v59 = vadd.f32 %v2424_v8, %v1638_v45 }
 0x2af   :  { %v2788_v49 = vsel %vm2732_vm1, %v2722_v6, 0.0  ;;  %v2723_v34 = vmul.f32 %v3507_v21, %v2652_v33  ;;  %3520 = vtanh.f32 %v3216_v26  ;;  %v3509_v31 = vpop.eup %3508  ;;  %v2819_v2 = vpop.permute.xlu0 %2818 }
 0x2b0   :  { %v2789_v50 = vadd.f32 %v2788_v49, %v2787_v4  ;;  %3522 = vtanh.f32 %v3217_v59  ;;  %v2726_v40 = vmul.f32 %v3509_v31, %v2667_v13  ;;  %v2823_v4 = vsub.s32 0, %v2822_v60 }
 0x2b1   :  { %v2790_v43 = vsel %vm2732_vm1, %v2723_v34, 0.0  ;;  %v2682_v29 = vpop.permute.xlu1 %2681 }
 0x2b2   :  { %v2791_v3 = vadd.f32 %v2790_v43, %v2789_v50  ;;  %v2796_v33 = vsel %vm2732_vm1, %v2726_v40, 0.0  ;;  %v2824_v42 = vrot.slane %v2819_v2, %v2823_v4 }
 0x2b4   :  { %v3511_v28 = vpop.eup %3510 }
 0x2b5   :  { %v3513_v22 = vpop.eup %3512  ;;  %v2724_v48 = vmul.f32 %v3511_v28, %v2657_v56  ;;  %v2692_v0 = vpop.permute.xlu1 %2691 }
 0x2b6   :  { %v3515_v7 = vpop.eup %3514  ;;  %v2727_v55 = vmul.f32 %v3513_v22, %v2672_v30 }
 0x2b7   :  { %v2792_v25 = vsel %vm2732_vm1, %v2724_v48, 0.0  ;;  %v2725_v17 = vmul.f32 %v3515_v7, %v2662_v38  ;;  %v3517_v11 = vpop.eup %3516 }
 0x2b8   :  { %v2793_v62 = vadd.f32 %v2792_v25, %v2791_v3  ;;  %v3519_v61 = vpop.eup %3518  ;;  %v2728_v47 = vmul.f32 %v3517_v11, %v2677_v35  ;;  %v2798_v54 = vsel %vm2732_vm1, %v2727_v55, 0.0 }
 0x2b9   :  { %v2794_v12 = vsel %vm2732_vm1, %v2725_v17, 0.0  ;;  %v3521_v16 = vpop.eup %3520  ;;  %v2729_v36 = vmul.f32 %v3519_v61, %v2682_v29 }
 0x2ba   :  { %v2795_v57 = vadd.f32 %v2794_v12, %v2793_v62  ;;  %v3523_v27 = vpop.eup %3522  ;;  %v2800_v53 = vsel %vm2732_vm1, %v2728_v47, 0.0  ;;  %v2730_v14 = vmul.f32 %v3521_v16, %v2687_v10 }
 0x2bb   :  { %v2802_v24 = vsel %vm2732_vm1, %v2729_v36, 0.0  ;;  %v2731_v1 = vmul.f32 %v3523_v27, %v2692_v0 }
 0x2bc   :  { %v2797_v5 = vadd.f32 %v2796_v33, %v2795_v57  ;;  %v2804_v37 = vsel %vm2732_vm1, %v2730_v14, 0.0 }
 0x2bd   :  { %v2807_v56 = vsel %vm2806_vm2, %v2731_v1, 0.0 }
 0x2be   :  { %v2799_v51 = vadd.f32 %v2798_v54, %v2797_v5 }
 0x2c0   :  { %v2801_v18 = vadd.f32 %v2800_v53, %v2799_v51 }
 0x2c2   :  { %v2803_v20 = vadd.f32 %v2802_v24, %v2801_v18 }
 0x2c4   :  { %v2805_v23 = vadd.f32 %v2804_v37, %v2803_v20 }
 0x2c6   :  { %v2808_v19 = vadd.f32 %v2807_v56, %v2805_v23 }
 0x2c8   :  { %v2809_v63 = vrot.slane %v2808_v19, 4 }
 0x2ca   :  { %v2810_v58 = vadd.f32 %v2809_v63, %v2808_v19 }
 0x2cc   :  { %v2811_v15 = vrot.slane %v2810_v58, 2 }
 0x2ce   :  { %v2812_v52 = vadd.f32 %v2811_v15, %v2810_v58 }
 0x2d0   :  { %v2813_v46 = vrot.slane %v2812_v52, 1 }
 0x2d2   :  { %v2814_v9 = vadd.f32 %v2813_v46, %v2812_v52 }
 0x2d4   :  { %v2825_v45 = vadd.f32 %v2824_v42, %v2814_v9 }
 0x2d6   :  { %v2994_v39 = vmul.f32 -1.442695, %v2825_v45 }
 0x2d8   :  { %3524 = vpow2.f32 %v2994_v39 }
 0x2e2   :  { %v3525_v44 = vpop.eup %3524 }
 0x2e3   :  { %v2829_v6 = vadd.f32 1.0, %v3525_v44 }
 0x2e5   :  { %3526 = vrcp.f32 %v2829_v6 }
 0x2ef   :  { %v3527_v8 = vpop.eup %3526 }
 0x2f0   :  { %2833 = vst.msk [vmem:[#allocation3] sm:$0x1] %vm2832_vm3, %v3527_v8 }
 0x2f1   :  { %3540 = shalt.err (!%p3537_p4)
}
 0x2f2   :  { %s3541_s20 = scalar_lea.hbm %s5150_s9, 16 }
 0x2f3   :  { %p3542_p5 = scmp.ne.s32.totalorder %s5150_s9, %s3541_s20  ;;  %p3545_p6 = scmp.lt.u32.totalorder %s3541_s20, %s5150_s9 }
 0x2f5   :  { %p3547_p7 = pnand %p3545_p6, %p3542_p5 }
 0x2f7   :  { %3550 = shalt.err (!%p3547_p7)
}
 0x2f8   :  { %2843 = dma.vmem_to_hbm [thread:$0]  %s2841_s8, 16, %s5150_s9, [#allocation4]  }
 0x2f9   :  { %3551 = dma.done.wait [#allocation4], 16  }
 0x2fa   :  { %3552 = vsyncadd [#allocation4], 4294967280 }
 0x2fb   :  { %2847 = vsyncpa [#allocation4], 1 }

</bundles_post_ra>
